<compile_context>
chip_gen: v5e
topology: v5e:2x2
jax: 0.10.0
libtpu: 0.0.40
codegen_flags: <defaults>
</compile_context>

<pallas_src>
import functools

import numpy as np

import jax
import jax.numpy as jnp
from jax.experimental import pallas as pl
from jax.experimental.pallas import tpu as pltpu

_LANE = 128
_NEG_INF = -1e30


def _round_up(x, m):
    return (x + m - 1) // m * m


def _pad_with_ones(d):
    # Lane-dense width that always leaves room for a constant "ones" column at
    # index d (used to fold the bias into the root-path matmul).
    return _round_up(d + 1, _LANE)


@functools.lru_cache(maxsize=1)
def _vmem_limit_bytes():
    """~75% of the physical per-core VMEM: ~96 MiB on v5e/v6e (128 MiB parts),
    ~48 MiB on v7x (64 MiB/TC)."""
    cap = 64 * 1024 * 1024
    try:
        cap = int(pltpu.get_tpu_info().vmem_capacity_bytes)
    except Exception:
        pass
    return int(cap) * 3 // 4


def _choose_tiles(num_nodes, fp_max, vmem_limit):
    """Pick (tm, tk, n_pad). tm as large as VMEM allows (amortizes grid
    overhead and cuts z_l re-reads) but capped so >=2 row tiles exist
    (v7x megacore). All tiles are power-of-two multiples of 128 so n_pad is a
    common multiple."""
    n128 = _round_up(num_nodes, _LANE)
    tk = 128
    for cand in (512, 256):
        if n128 >= cand:
            tk = cand
            break
    tm = 128
    budget = vmem_limit // 2  # headroom for Mosaic internals / double buffers
    for cand in (2048, 1024, 512, 256):
        if _round_up(num_nodes, cand) // cand < 2:
            continue  # keep >=2 "parallel" row tiles so both v7x TCs get work
        est = (2 * cand * tk              # int8 A tile, double buffered
               + 2 * tk * fp_max * 2      # z_l tile (bf16)
               + 2 * cand * fp_max * 2    # z_r tile (bf16)
               + 2 * cand * fp_max * 4    # out tile (f32 worst case)
               + cand * fp_max * 4)       # f32 accumulator scratch
        if est <= budget:
            tm = cand
            break
    n_pad = _round_up(num_nodes, max(tm, tk))
    return tm, tk, n_pad


# ------------------------------------------------------------ kernel 1: x @ W
def _project_kernel(x_ref, w_ref, z_ref):
    z_ref[...] = jnp.dot(
        x_ref[...], w_ref[...], preferred_element_type=jnp.float32
    ).astype(z_ref.dtype)


def project(x, w_cat, *, tm, vmem_limit):
    """z = x @ [W_l | W_r_aug], row-tiled. x:(Np,Fin) bf16, w_cat:(Fin,2*Fp) bf16."""
    n, fin = x.shape
    fout2 = w_cat.shape[1]
    # Shrink the row tile if (double-buffered x + resident weights + out) would
    # not leave VMEM headroom (tiles stay power-of-two multiples of 128).
    while tm > 128 and (2 * tm * fin * 2 + fin * fout2 * 2
                        + 2 * tm * fout2 * 2) > vmem_limit // 2:
        tm //= 2
    return pl.pallas_call(
        _project_kernel,
        out_shape=jax.ShapeDtypeStruct((n, fout2), jnp.bfloat16),
        grid_spec=pltpu.PrefetchScalarGridSpec(
            num_scalar_prefetch=0,
            grid=(n // tm,),
            in_specs=[
                pl.BlockSpec((tm, fin), lambda i: (i, 0)),
                pl.BlockSpec((fin, fout2), lambda i: (0, 0)),  # weights resident
            ],
            out_specs=pl.BlockSpec((tm, fout2), lambda i: (i, 0)),
        ),
        compiler_params=pltpu.CompilerParams(
            dimension_semantics=("parallel",),
            vmem_limit_bytes=vmem_limit),
    )(x, w_cat)


# ------------------------------------ kernel 2: out = invdeg*(A01 @ z_l) + z_r
def _aggregate_kernel(cid_ref, nnz_ref, a_ref, zl_ref, zr_ref, invd_ref,
                      out_ref, acc_ref, *, apply_relu, apply_logsoftmax):
    i = pl.program_id(0)
    k = pl.program_id(1)

    @pl.when(k == 0)
    def _init():
        acc_ref[...] = jnp.zeros_like(acc_ref)

    # Block-sparse skip: only the (data-dependent) nonzero A tiles of this row
    # tile are accumulated. Padded steps repeat the previous block index in the
    # index_map (revisit => no DMA) and are skipped here (no MXU work).
    @pl.when(k < nnz_ref[i])
    def _accum():
        # int8 0/1 adjacency halves HBM traffic; cast to bf16 in VMEM before
        # the dot (never feed int8 to the MXU -- v7x has no integer MAC path).
        a = a_ref[...].astype(jnp.float32).astype(jnp.bfloat16)
        acc_ref[...] += jnp.dot(a, zl_ref[...],
                                preferred_element_type=jnp.float32)

    @pl.when(k == pl.num_programs(1) - 1)
    def _finalize():
        # Mean aggregation: exact f32 1/deg row scale applied once per output
        # tile, then the root/self term (bias already folded into z_r).
        h = acc_ref[...] * invd_ref[...] + zr_ref[...].astype(jnp.float32)
        if apply_relu:
            h = jnp.maximum(h, 0.0)
            # dropout(p=0.5, training=False) is the identity at inference.
        if apply_logsoftmax:
            m = jnp.max(h, axis=-1, keepdims=True)
            lse = m + jnp.log(jnp.sum(jnp.exp(h - m), axis=-1, keepdims=True))
            h = h - lse
        out_ref[...] = h.astype(out_ref.dtype)


def aggregate(a8, z, inv_deg, col_ids, nnz, *, tm, tk, apply_relu,
              apply_logsoftmax, out_dtype, vmem_limit):
    """out = inv_deg * (A01 @ z[:, :Fp]) + z[:, Fp:], block-sparse over k."""
    n = a8.shape[0]
    fp = z.shape[1] // 2
    n_i = n // tm
    max_k = col_ids.shape[0] // n_i          # compacted nonzero-tile count/row
    kernel = functools.partial(_aggregate_kernel,
                               apply_relu=apply_relu,
                               apply_logsoftmax=apply_logsoftmax)
    # Data-dependent index maps driven by the scalar-prefetched (SMEM) tables.
    a_map = lambda i, k, c, m: (i, c[i * max_k + k])
    zl_map = lambda i, k, c, m: (c[i * max_k + k], 0)
    zr_map = lambda i, k, c, m: (i, 1)
    invd_map = lambda i, k, c, m: (i, 0)
    out_map = lambda i, k, c, m: (i, 0)
    return pl.pallas_call(
        kernel,
        out_shape=jax.ShapeDtypeStruct((n, fp), out_dtype),
        grid_spec=pltpu.PrefetchScalarGridSpec(
            num_scalar_prefetch=2,
            grid=(n_i, max_k),
            in_specs=[
                pl.BlockSpec((tm, tk), a_map),    # int8 0/1 adjacency tile
                pl.BlockSpec((tk, fp), zl_map),   # z_l = z[:, :Fp] (gathered)
                pl.BlockSpec((tm, fp), zr_map),   # z_r = z[:, Fp:] (per-i)
                pl.BlockSpec((tm, 1), invd_map),  # f32 1/deg per row
            ],
            out_specs=pl.BlockSpec((tm, fp), out_map),
            scratch_shapes=[pltpu.VMEM((tm, fp), jnp.float32)],
        ),
        compiler_params=pltpu.CompilerParams(
            dimension_semantics=("parallel", "arbitrary"),
            vmem_limit_bytes=vmem_limit),
    )(col_ids, nnz, a8, z, z, inv_deg)


# ------------------------------------------------------------------ glue code
def _prepare_layer(w_l, w_r, b, *, final):
    """Pad weights lane-dense, fuse [W_l | W_r] and fold the bias into W_r via
    the input's constant ones column (row index = inc)."""
    inc, outc = w_l.shape
    in_pad = _pad_with_ones(inc)
    fp = _round_up(outc, _LANE) if final else _pad_with_ones(outc)
    wl = jnp.zeros((in_pad, fp), jnp.float32).at[:inc, :outc].set(w_l)
    wr = jnp.zeros((in_pad, fp), jnp.float32).at[:inc, :outc].set(w_r)
    wr = wr.at[inc, :outc].set(b.reshape(-1))        # bias via ones column
    if final:
        if outc < fp:
            # -1e30 in padded class columns so the fused log_softmax masks them.
            wr = wr.at[inc, outc:].set(_NEG_INF)
    else:
        # Forward a fresh 1.0 ones column (at index outc) to the next layer.
        wr = wr.at[inc, outc].set(1.0)
    w_cat = jnp.concatenate([wl, wr], axis=1).astype(jnp.bfloat16)
    return w_cat


def sage_forward(params, h, a8, inv_deg, col_ids, nnz, *, tm, tk, vmem_limit):
    num_layers = len(params)
    for li, (w_l, w_r, b) in enumerate(params):
        last = li == num_layers - 1
        w_cat = _prepare_layer(w_l, w_r, b, final=last)
        # Associativity: A @ (x @ W_l) instead of (A @ x) @ W_l, so the big
        # N x N matmul runs at lane width Fp instead of the input feature width.
        z = project(h, w_cat, tm=tm, vmem_limit=vmem_limit)
        h = aggregate(a8, z, inv_deg, col_ids, nnz, tm=tm, tk=tk,
                      apply_relu=not last, apply_logsoftmax=last,
                      out_dtype=jnp.float32 if last else jnp.bfloat16,
                      vmem_limit=vmem_limit)
    return h


def preprocess_graph(edge_index, num_nodes, n_pad, tm, tk):
    """Host-side: dense 0/1 (edge-count) int8 adjacency, f32 1/deg, and the
    compacted per-row-tile list of nonzero (tm x tk) column tiles."""
    src = np.asarray(edge_index[0], dtype=np.int64)
    dst = np.asarray(edge_index[1], dtype=np.int64)
    counts = np.zeros((n_pad, n_pad), dtype=np.int32)
    np.add.at(counts, (dst, src), 1)          # edge multiplicity (mean aggr)
    deg = counts.sum(axis=1)
    inv_deg = (1.0 / np.maximum(deg, 1)).astype(np.float32).reshape(n_pad, 1)
    a8 = counts.astype(np.int8)               # multiplicities are tiny

    n_i, n_k = n_pad // tm, n_pad // tk
    occ = counts.reshape(n_i, tm, n_k, tk).sum(axis=(1, 3)) > 0
    nnz = occ.sum(axis=1).astype(np.int32)
    max_k = max(1, int(nnz.max()))
    col_ids = np.zeros((n_i, max_k), dtype=np.int32)
    for i in range(n_i):
        cols = np.nonzero(occ[i])[0]
        if cols.size:
            col_ids[i, :cols.size] = cols
            col_ids[i, cols.size:] = cols[-1]  # repeat last tile -> no extra DMA
    return (jnp.asarray(a8), jnp.asarray(inv_deg),
            jnp.asarray(col_ids.reshape(-1)), jnp.asarray(nnz))


def init_sage_params(key, num_features, hidden_channels, num_layers, num_classes):
    params = []
    for i in range(num_layers):
        inc = num_features if i == 0 else hidden_channels
        outc = num_classes if i == num_layers - 1 else hidden_channels
        key, k1, k2 = jax.random.split(key, 3)
        scale = 1.0 / jnp.sqrt(jnp.float32(inc))
        w_l = jax.random.uniform(k1, (inc, outc), jnp.float32, -scale, scale)
        w_r = jax.random.uniform(k2, (inc, outc), jnp.float32, -scale, scale)
        b = jnp.zeros((outc,), jnp.float32)
        params.append((w_l, w_r, b))
    return params


def run_sage(params, x, edge_index):
    num_nodes, num_features = x.shape
    num_layers = len(params)
    num_classes = params[-1][0].shape[1]
    vmem_limit = _vmem_limit_bytes()

    fp_max = 0
    for li, (w_l, _, _) in enumerate(params):
        outc = w_l.shape[1]
        fp = _round_up(outc, _LANE) if li == num_layers - 1 else _pad_with_ones(outc)
        fp_max = max(fp_max, fp)

    tm, tk, n_pad = _choose_tiles(num_nodes, fp_max, vmem_limit)
    a8, inv_deg, col_ids, nnz = preprocess_graph(edge_index, num_nodes,
                                                 n_pad, tm, tk)

    in_pad0 = _pad_with_ones(num_features)    # lane-dense layer-0 features
    h0 = np.zeros((n_pad, in_pad0), np.float32)
    h0[:num_nodes, :num_features] = np.asarray(x)
    h0[:, num_features] = 1.0                 # ones column feeding folded bias
    h0 = jnp.asarray(h0, dtype=jnp.bfloat16)

    fwd = jax.jit(functools.partial(sage_forward, tm=tm, tk=tk,
                                    vmem_limit=vmem_limit))
    out = fwd(params, h0, a8, inv_deg, col_ids, nnz)
    return out[:num_nodes, :num_classes]


def sage_reference(params, x, edge_index, num_nodes):
    """Pure numpy f32 reference of the PyTorch module (eval mode)."""
    counts = np.zeros((num_nodes, num_nodes), np.float32)
    np.add.at(counts, (np.asarray(edge_index[1]), np.asarray(edge_index[0])), 1.0)
    deg = counts.sum(axis=1, keepdims=True)
    a = counts / np.maximum(deg, 1.0)
    h = np.asarray(x, np.float32)
    for li, (w_l, w_r, b) in enumerate(params):
        h = a @ h @ np.asarray(w_l) + h @ np.asarray(w_r) + np.asarray(b)
        if li != len(params) - 1:
            h = np.maximum(h, 0.0)
    h = h - h.max(axis=1, keepdims=True)
    return h - np.log(np.exp(h).sum(axis=1, keepdims=True))


if __name__ == "__main__":
    num_nodes = 128
    num_features = 32
    hidden_channels = 32
    num_layers = 2
    num_classes = 8
    num_edges = 512

    key = jax.random.PRNGKey(0)
    kx, ke, kp = jax.random.split(key, 3)

    x = jax.random.normal(kx, (num_nodes, num_features), jnp.float32)
    edge_index = jax.random.randint(ke, (2, num_edges), 0, num_nodes,
                                    dtype=jnp.int32)
    params = init_sage_params(kp, num_features, hidden_channels,
                              num_layers, num_classes)

    out = run_sage(params, x, edge_index)
    out = jax.block_until_ready(out)

    assert out.shape == (num_nodes, num_classes)
    # log_softmax rows must sum (in prob space) to ~1
    assert bool(jnp.allclose(jnp.sum(jnp.exp(out), axis=-1), 1.0, atol=1e-4))
    # loose parity vs f32 reference (bf16 activations/weights)
    ref = sage_reference(params, x, edge_index, num_nodes)
    assert float(np.max(np.abs(np.asarray(out, np.float32) - ref))) < 0.1
    print("KERNEL_OK")
</pallas_src>

<mosaic_0001>
module attributes {stable_mosaic.version = 11 : i64} {
  func.func @_project_kernel(%arg0: i32, %arg1: memref<128x128xbf16, #tpu.memory_space<vmem>>, %arg2: memref<128x256xbf16, #tpu.memory_space<vmem>>, %arg3: memref<128x256xbf16, #tpu.memory_space<vmem>>) attributes {dimension_semantics = [#tpu.dimension_semantics<parallel>], iteration_bounds = array<i64: 1>, scalar_prefetch = 0 : i64, scratch_operands = 0 : i64, tpu.core_type = #tpu.core_type<tc>, window_params = [{transform_indices = @transform_0, window_bounds = array<i64: 128, 128>}, {pipeline_mode = #tpu.pipeline_mode<synchronous>, transform_indices = @transform_1, window_bounds = array<i64: 128, 256>}, {transform_indices = @transform_2, window_bounds = array<i64: 128, 256>}]} {
    %c0 = arith.constant 0 : index
    %c0_0 = arith.constant 0 : index
    %0 = vector.load %arg1[%c0, %c0_0] : memref<128x128xbf16, #tpu.memory_space<vmem>>, vector<128x128xbf16>
    %c0_1 = arith.constant 0 : index
    %c0_2 = arith.constant 0 : index
    %1 = vector.load %arg2[%c0_1, %c0_2] : memref<128x256xbf16, #tpu.memory_space<vmem>>, vector<128x256xbf16>
    %cst = arith.constant dense<0.000000e+00> : vector<128x256xf32>
    %2 = tpu.matmul %0, %1, %cst {dimension_numbers = #tpu.dot_dimension_numbers<[1], [0], [0], [1], [0, 0, 1, 1], [], []>} : vector<128x128xbf16>, vector<128x256xbf16>, vector<128x256xf32> -> vector<128x256xf32>
    %3 = arith.truncf %2 : vector<128x256xf32> to vector<128x256xbf16>
    %c0_3 = arith.constant 0 : index
    %c0_4 = arith.constant 0 : index
    %4 = vector.load %arg3[%c0_3, %c0_4] : memref<128x256xbf16, #tpu.memory_space<vmem>>, vector<128x256xbf16>
    tpu.vector_store %arg3[%c0_3, %c0_4], %3 {strides = array<i32>} : memref<128x256xbf16, #tpu.memory_space<vmem>>, vector<128x256xbf16>,
    return
  }
  func.func @transform_0(%arg0: i32) -> (i32, i32) {
    %c0_i32 = arith.constant 0 : i32
    %c0_i32_0 = arith.constant 0 : i32
    return %arg0, %c0_i32 : i32, i32
  }
  func.func @transform_1(%arg0: i32) -> (i32, i32) {
    %c0_i32 = arith.constant 0 : i32
    %c0_i32_0 = arith.constant 0 : i32
    %c0_i32_1 = arith.constant 0 : i32
    return %c0_i32, %c0_i32_0 : i32, i32
  }
  func.func @transform_2(%arg0: i32) -> (i32, i32) {
    %c0_i32 = arith.constant 0 : i32
    %c0_i32_0 = arith.constant 0 : i32
    return %arg0, %c0_i32 : i32, i32
  }
}

module attributes {stable_mosaic.version = 11 : i64} {
  func.func @_aggregate_kernel(%arg0: i32, %arg1: i32, %arg2: memref<1xi32, #tpu.memory_space<smem>>, %arg3: memref<1xi32, #tpu.memory_space<smem>>, %arg4: memref<128x128xi8, #tpu.memory_space<vmem>>, %arg5: memref<128x128xbf16, #tpu.memory_space<vmem>>, %arg6: memref<128x128xbf16, #tpu.memory_space<vmem>>, %arg7: memref<128x1xf32, #tpu.memory_space<vmem>>, %arg8: memref<128x128xbf16, #tpu.memory_space<vmem>>, %arg9: memref<128x128xf32, #tpu.memory_space<vmem>>) attributes {dimension_semantics = [#tpu.dimension_semantics<parallel>, #tpu.dimension_semantics<arbitrary>], iteration_bounds = array<i64: 1, 1>, scalar_prefetch = 2 : i64, scratch_operands = 1 : i64, tpu.core_type = #tpu.core_type<tc>, window_params = [{transform_indices = @transform_0, window_bounds = array<i64: 128, 128>}, {transform_indices = @transform_1, window_bounds = array<i64: 128, 128>}, {transform_indices = @transform_2, window_bounds = array<i64: 128, 128>}, {transform_indices = @transform_3, window_bounds = array<i64: 128, 1>}, {transform_indices = @transform_4, window_bounds = array<i64: 128, 128>}]} {
    %c0_i32 = arith.constant 0 : i32
    %0 = arith.cmpi eq, %arg1, %c0_i32 : i32
    %1 = arith.extui %0 : i1 to i32
    %c0_i32_0 = arith.constant 0 : i32
    %2 = arith.cmpi ne, %1, %c0_i32_0 : i32
    scf.if %2 {
      %cst = arith.constant 0.000000e+00 : f32
      %11 = vector.broadcast %cst : f32 to vector<128x128xf32>
      %c0 = arith.constant 0 : index
      %c0_4 = arith.constant 0 : index
      %12 = vector.load %arg9[%c0, %c0_4] : memref<128x128xf32, #tpu.memory_space<vmem>>, vector<128x128xf32>
      tpu.vector_store %arg9[%c0, %c0_4], %11 {strides = array<i32>} : memref<128x128xf32, #tpu.memory_space<vmem>>, vector<128x128xf32>,
    } else {
    }
    %3 = arith.index_cast %arg0 : i32 to index
    %4 = memref.load %arg3[%3] : memref<1xi32, #tpu.memory_space<smem>>
    %5 = arith.cmpi slt, %arg1, %4 : i32
    %6 = arith.extui %5 : i1 to i32
    %c0_i32_1 = arith.constant 0 : i32
    %7 = arith.cmpi ne, %6, %c0_i32_1 : i32
    scf.if %7 {
      %c0 = arith.constant 0 : index
      %c0_4 = arith.constant 0 : index
      %11 = vector.load %arg4[%c0, %c0_4] : memref<128x128xi8, #tpu.memory_space<vmem>>, vector<128x128xi8>
      %12 = arith.sitofp %11 : vector<128x128xi8> to vector<128x128xf32>
      %13 = arith.truncf %12 : vector<128x128xf32> to vector<128x128xbf16>
      %c0_5 = arith.constant 0 : index
      %c0_6 = arith.constant 0 : index
      %14 = vector.load %arg9[%c0_5, %c0_6] : memref<128x128xf32, #tpu.memory_space<vmem>>, vector<128x128xf32>
      %c0_7 = arith.constant 0 : index
      %c0_8 = arith.constant 0 : index
      %15 = vector.load %arg5[%c0_7, %c0_8] : memref<128x128xbf16, #tpu.memory_space<vmem>>, vector<128x128xbf16>
      %cst = arith.constant dense<0.000000e+00> : vector<128x128xf32>
      %16 = tpu.matmul %13, %15, %cst {dimension_numbers = #tpu.dot_dimension_numbers<[1], [0], [0], [1], [0, 0, 1, 1], [], []>} : vector<128x128xbf16>, vector<128x128xbf16>, vector<128x128xf32> -> vector<128x128xf32>
      %17 = arith.addf %14, %16 : vector<128x128xf32>
      %c0_9 = arith.constant 0 : index
      %c0_10 = arith.constant 0 : index
      %18 = vector.load %arg9[%c0_9, %c0_10] : memref<128x128xf32, #tpu.memory_space<vmem>>, vector<128x128xf32>
      tpu.vector_store %arg9[%c0_9, %c0_10], %17 {strides = array<i32>} : memref<128x128xf32, #tpu.memory_space<vmem>>, vector<128x128xf32>,
    } else {
    }
    %c0_i32_2 = arith.constant 0 : i32
    %8 = arith.cmpi eq, %arg1, %c0_i32_2 : i32
    %9 = arith.extui %8 : i1 to i32
    %c0_i32_3 = arith.constant 0 : i32
    %10 = arith.cmpi ne, %9, %c0_i32_3 : i32
    scf.if %10 {
      %c0 = arith.constant 0 : index
      %c0_4 = arith.constant 0 : index
      %11 = vector.load %arg9[%c0, %c0_4] : memref<128x128xf32, #tpu.memory_space<vmem>>, vector<128x128xf32>
      %c0_5 = arith.constant 0 : index
      %c0_6 = arith.constant 0 : index
      %12 = vector.load %arg7[%c0_5, %c0_6] : memref<128x1xf32, #tpu.memory_space<vmem>>, vector<128x1xf32>
      %13 = vector.broadcast %12 : vector<128x1xf32> to vector<128x128xf32>
      %14 = arith.mulf %11, %13 : vector<128x128xf32>
      %c0_7 = arith.constant 0 : index
      %c0_8 = arith.constant 0 : index
      %15 = vector.load %arg6[%c0_7, %c0_8] : memref<128x128xbf16, #tpu.memory_space<vmem>>, vector<128x128xbf16>
      %16 = arith.extf %15 : vector<128x128xbf16> to vector<128x128xf32>
      %17 = arith.addf %14, %16 : vector<128x128xf32>
      %cst = arith.constant 0.000000e+00 : f32
      %18 = vector.broadcast %cst : f32 to vector<128x128xf32>
      %19 = arith.maximumf %17, %18 : vector<128x128xf32>
      %20 = arith.truncf %19 : vector<128x128xf32> to vector<128x128xbf16>
      %c0_9 = arith.constant 0 : index
      %c0_10 = arith.constant 0 : index
      %21 = vector.load %arg8[%c0_9, %c0_10] : memref<128x128xbf16, #tpu.memory_space<vmem>>, vector<128x128xbf16>
      tpu.vector_store %arg8[%c0_9, %c0_10], %20 {strides = array<i32>} : memref<128x128xbf16, #tpu.memory_space<vmem>>, vector<128x128xbf16>,
    } else {
    }
    return
  }
  func.func @transform_0(%arg0: i32, %arg1: i32, %arg2: memref<1xi32, #tpu.memory_space<smem>>, %arg3: memref<1xi32, #tpu.memory_space<smem>>) -> (i32, i32) {
    %c1_i32 = arith.constant 1 : i32
    %0 = arith.muli %arg0, %c1_i32 : i32
    %1 = arith.addi %0, %arg1 : i32
    %2 = arith.index_cast %1 : i32 to index
    %3 = memref.load %arg2[%2] : memref<1xi32, #tpu.memory_space<smem>>
    %c0_i32 = arith.constant 0 : i32
    return %arg0, %3 : i32, i32
  }
  func.func @transform_1(%arg0: i32, %arg1: i32, %arg2: memref<1xi32, #tpu.memory_space<smem>>, %arg3: memref<1xi32, #tpu.memory_space<smem>>) -> (i32, i32) {
    %c1_i32 = arith.constant 1 : i32
    %0 = arith.muli %arg0, %c1_i32 : i32
    %1 = arith.addi %0, %arg1 : i32
    %2 = arith.index_cast %1 : i32 to index
    %3 = memref.load %arg2[%2] : memref<1xi32, #tpu.memory_space<smem>>
    %c0_i32 = arith.constant 0 : i32
    %c0_i32_0 = arith.constant 0 : i32
    return %3, %c0_i32 : i32, i32
  }
  func.func @transform_2(%arg0: i32, %arg1: i32, %arg2: memref<1xi32, #tpu.memory_space<smem>>, %arg3: memref<1xi32, #tpu.memory_space<smem>>) -> (i32, i32) {
    %c1_i32 = arith.constant 1 : i32
    %c0_i32 = arith.constant 0 : i32
    return %arg0, %c1_i32 : i32, i32
  }
  func.func @transform_3(%arg0: i32, %arg1: i32, %arg2: memref<1xi32, #tpu.memory_space<smem>>, %arg3: memref<1xi32, #tpu.memory_space<smem>>) -> (i32, i32) {
    %c0_i32 = arith.constant 0 : i32
    %c0_i32_0 = arith.constant 0 : i32
    return %arg0, %c0_i32 : i32, i32
  }
  func.func @transform_4(%arg0: i32, %arg1: i32, %arg2: memref<1xi32, #tpu.memory_space<smem>>, %arg3: memref<1xi32, #tpu.memory_space<smem>>) -> (i32, i32) {
    %c0_i32 = arith.constant 0 : i32
    %c0_i32_0 = arith.constant 0 : i32
    return %arg0, %c0_i32 : i32, i32
  }
}

module attributes {stable_mosaic.version = 11 : i64} {
  func.func @_aggregate_kernel(%arg0: i32, %arg1: i32, %arg2: memref<1xi32, #tpu.memory_space<smem>>, %arg3: memref<1xi32, #tpu.memory_space<smem>>, %arg4: memref<128x128xi8, #tpu.memory_space<vmem>>, %arg5: memref<128x128xbf16, #tpu.memory_space<vmem>>, %arg6: memref<128x128xbf16, #tpu.memory_space<vmem>>, %arg7: memref<128x1xf32, #tpu.memory_space<vmem>>, %arg8: memref<128x128xf32, #tpu.memory_space<vmem>>, %arg9: memref<128x128xf32, #tpu.memory_space<vmem>>) attributes {dimension_semantics = [#tpu.dimension_semantics<parallel>, #tpu.dimension_semantics<arbitrary>], iteration_bounds = array<i64: 1, 1>, scalar_prefetch = 2 : i64, scratch_operands = 1 : i64, tpu.core_type = #tpu.core_type<tc>, window_params = [{transform_indices = @transform_0, window_bounds = array<i64: 128, 128>}, {transform_indices = @transform_1, window_bounds = array<i64: 128, 128>}, {transform_indices = @transform_2, window_bounds = array<i64: 128, 128>}, {transform_indices = @transform_3, window_bounds = array<i64: 128, 1>}, {transform_indices = @transform_4, window_bounds = array<i64: 128, 128>}]} {
    %c0_i32 = arith.constant 0 : i32
    %0 = arith.cmpi eq, %arg1, %c0_i32 : i32
    %1 = arith.extui %0 : i1 to i32
    %c0_i32_0 = arith.constant 0 : i32
    %2 = arith.cmpi ne, %1, %c0_i32_0 : i32
    scf.if %2 {
      %cst = arith.constant 0.000000e+00 : f32
      %11 = vector.broadcast %cst : f32 to vector<128x128xf32>
      %c0 = arith.constant 0 : index
      %c0_4 = arith.constant 0 : index
      %12 = vector.load %arg9[%c0, %c0_4] : memref<128x128xf32, #tpu.memory_space<vmem>>, vector<128x128xf32>
      tpu.vector_store %arg9[%c0, %c0_4], %11 {strides = array<i32>} : memref<128x128xf32, #tpu.memory_space<vmem>>, vector<128x128xf32>,
    } else {
    }
    %3 = arith.index_cast %arg0 : i32 to index
    %4 = memref.load %arg3[%3] : memref<1xi32, #tpu.memory_space<smem>>
    %5 = arith.cmpi slt, %arg1, %4 : i32
    %6 = arith.extui %5 : i1 to i32
    %c0_i32_1 = arith.constant 0 : i32
    %7 = arith.cmpi ne, %6, %c0_i32_1 : i32
    scf.if %7 {
      %c0 = arith.constant 0 : index
      %c0_4 = arith.constant 0 : index
      %11 = vector.load %arg4[%c0, %c0_4] : memref<128x128xi8, #tpu.memory_space<vmem>>, vector<128x128xi8>
      %12 = arith.sitofp %11 : vector<128x128xi8> to vector<128x128xf32>
      %13 = arith.truncf %12 : vector<128x128xf32> to vector<128x128xbf16>
      %c0_5 = arith.constant 0 : index
      %c0_6 = arith.constant 0 : index
      %14 = vector.load %arg9[%c0_5, %c0_6] : memref<128x128xf32, #tpu.memory_space<vmem>>, vector<128x128xf32>
      %c0_7 = arith.constant 0 : index
      %c0_8 = arith.constant 0 : index
      %15 = vector.load %arg5[%c0_7, %c0_8] : memref<128x128xbf16, #tpu.memory_space<vmem>>, vector<128x128xbf16>
      %cst = arith.constant dense<0.000000e+00> : vector<128x128xf32>
      %16 = tpu.matmul %13, %15, %cst {dimension_numbers = #tpu.dot_dimension_numbers<[1], [0], [0], [1], [0, 0, 1, 1], [], []>} : vector<128x128xbf16>, vector<128x128xbf16>, vector<128x128xf32> -> vector<128x128xf32>
      %17 = arith.addf %14, %16 : vector<128x128xf32>
      %c0_9 = arith.constant 0 : index
      %c0_10 = arith.constant 0 : index
      %18 = vector.load %arg9[%c0_9, %c0_10] : memref<128x128xf32, #tpu.memory_space<vmem>>, vector<128x128xf32>
      tpu.vector_store %arg9[%c0_9, %c0_10], %17 {strides = array<i32>} : memref<128x128xf32, #tpu.memory_space<vmem>>, vector<128x128xf32>,
    } else {
    }
    %c0_i32_2 = arith.constant 0 : i32
    %8 = arith.cmpi eq, %arg1, %c0_i32_2 : i32
    %9 = arith.extui %8 : i1 to i32
    %c0_i32_3 = arith.constant 0 : i32
    %10 = arith.cmpi ne, %9, %c0_i32_3 : i32
    scf.if %10 {
      %c0 = arith.constant 0 : index
      %c0_4 = arith.constant 0 : index
      %11 = vector.load %arg9[%c0, %c0_4] : memref<128x128xf32, #tpu.memory_space<vmem>>, vector<128x128xf32>
      %c0_5 = arith.constant 0 : index
      %c0_6 = arith.constant 0 : index
      %12 = vector.load %arg7[%c0_5, %c0_6] : memref<128x1xf32, #tpu.memory_space<vmem>>, vector<128x1xf32>
      %13 = vector.broadcast %12 : vector<128x1xf32> to vector<128x128xf32>
      %14 = arith.mulf %11, %13 : vector<128x128xf32>
      %c0_7 = arith.constant 0 : index
      %c0_8 = arith.constant 0 : index
      %15 = vector.load %arg6[%c0_7, %c0_8] : memref<128x128xbf16, #tpu.memory_space<vmem>>, vector<128x128xbf16>
      %16 = arith.extf %15 : vector<128x128xbf16> to vector<128x128xf32>
      %17 = arith.addf %14, %16 : vector<128x128xf32>
      %cst = arith.constant dense<0xFF800000> : vector<128xf32>
      %18 = vector.multi_reduction <maximumf>, %17, %cst [1] : vector<128x128xf32> to vector<128xf32>
      %19 = vector.shape_cast %18 : vector<128xf32> to vector<128x1xf32>
      %20 = vector.broadcast %19 : vector<128x1xf32> to vector<128x128xf32>
      %21 = arith.subf %17, %20 : vector<128x128xf32>
      %22 = math.exp %21 : vector<128x128xf32>
      %cst_9 = arith.constant dense<0.000000e+00> : vector<128xf32>
      %23 = vector.multi_reduction <add>, %22, %cst_9 [1] : vector<128x128xf32> to vector<128xf32>
      %24 = vector.shape_cast %23 : vector<128xf32> to vector<128x1xf32>
      %25 = math.log %24 : vector<128x1xf32>
      %26 = arith.addf %19, %25 : vector<128x1xf32>
      %27 = vector.broadcast %26 : vector<128x1xf32> to vector<128x128xf32>
      %28 = arith.subf %17, %27 : vector<128x128xf32>
      %c0_10 = arith.constant 0 : index
      %c0_11 = arith.constant 0 : index
      %29 = vector.load %arg8[%c0_10, %c0_11] : memref<128x128xf32, #tpu.memory_space<vmem>>, vector<128x128xf32>
      tpu.vector_store %arg8[%c0_10, %c0_11], %28 {strides = array<i32>} : memref<128x128xf32, #tpu.memory_space<vmem>>, vector<128x128xf32>,
    } else {
    }
    return
  }
  func.func @transform_0(%arg0: i32, %arg1: i32, %arg2: memref<1xi32, #tpu.memory_space<smem>>, %arg3: memref<1xi32, #tpu.memory_space<smem>>) -> (i32, i32) {
    %c1_i32 = arith.constant 1 : i32
    %0 = arith.muli %arg0, %c1_i32 : i32
    %1 = arith.addi %0, %arg1 : i32
    %2 = arith.index_cast %1 : i32 to index
    %3 = memref.load %arg2[%2] : memref<1xi32, #tpu.memory_space<smem>>
    %c0_i32 = arith.constant 0 : i32
    return %arg0, %3 : i32, i32
  }
  func.func @transform_1(%arg0: i32, %arg1: i32, %arg2: memref<1xi32, #tpu.memory_space<smem>>, %arg3: memref<1xi32, #tpu.memory_space<smem>>) -> (i32, i32) {
    %c1_i32 = arith.constant 1 : i32
    %0 = arith.muli %arg0, %c1_i32 : i32
    %1 = arith.addi %0, %arg1 : i32
    %2 = arith.index_cast %1 : i32 to index
    %3 = memref.load %arg2[%2] : memref<1xi32, #tpu.memory_space<smem>>
    %c0_i32 = arith.constant 0 : i32
    %c0_i32_0 = arith.constant 0 : i32
    return %3, %c0_i32 : i32, i32
  }
  func.func @transform_2(%arg0: i32, %arg1: i32, %arg2: memref<1xi32, #tpu.memory_space<smem>>, %arg3: memref<1xi32, #tpu.memory_space<smem>>) -> (i32, i32) {
    %c1_i32 = arith.constant 1 : i32
    %c0_i32 = arith.constant 0 : i32
    return %arg0, %c1_i32 : i32, i32
  }
  func.func @transform_3(%arg0: i32, %arg1: i32, %arg2: memref<1xi32, #tpu.memory_space<smem>>, %arg3: memref<1xi32, #tpu.memory_space<smem>>) -> (i32, i32) {
    %c0_i32 = arith.constant 0 : i32
    %c0_i32_0 = arith.constant 0 : i32
    return %arg0, %c0_i32 : i32, i32
  }
  func.func @transform_4(%arg0: i32, %arg1: i32, %arg2: memref<1xi32, #tpu.memory_space<smem>>, %arg3: memref<1xi32, #tpu.memory_space<smem>>) -> (i32, i32) {
    %c0_i32 = arith.constant 0 : i32
    %c0_i32_0 = arith.constant 0 : i32
    return %arg0, %c0_i32 : i32, i32
  }
}

</mosaic_0001>

<bundles_post_ra>
// kernel: sage_forward.4
= control target key start
LH: loop header
LB: loop body
LE: loop exit
PB: predicated region body
PF: predicated region fallthrough
CT: control target
= control target key end

     0   :  { %s624_s1 = inlined_call_operand.vmem [shape: bf16[128,256], index: 1, kind: input, shape index: {}]   ;;  %s625_s0 = inlined_call_operand.vmem [shape: bf16[128,128], index: 0, kind: input, shape index: {}]   ;;  %s626_s2 = inlined_call_operand.vmem [shape: bf16[128,256], index: 2, kind: output, shape index: {}]  }
   0x1   :  { %v395_v0 = vld [vmem:[%s624_s1 + $0x70] sm:$0xf]  ;;  %v424_v1 = vld [vmem:[%s624_s1 + $0x74] sm:$0xf0]  ;;  %v423_v2 = vld [vmem:[%s624_s1 + $0x74] sm:$0xf] }
   0x2   :  { %v396_v3 = vor.u32 %v424_v1, %v395_v0  ;;  %v397_v4 = vld [vmem:[%s624_s1 + $0x78] sm:$0xf0]  ;;  %v387_v5 = vld [vmem:[%s624_s1 + $0x60] sm:$0xf]  ;;  %v422_v6 = vld [vmem:[%s624_s1 + $0x64] sm:$0xf0] }
   0x3   :  { %v400_v7 = vor.u32 %v423_v2, %v397_v4  ;;  %v421_v8 = vld [vmem:[%s624_s1 + $0x64] sm:$0xf]  ;;  %v389_v9 = vld [vmem:[%s624_s1 + $0x68] sm:$0xf0]  ;;  %v388_v10 = vor.u32 %v422_v6, %v387_v5  ;;  %v379_v12 = vld [vmem:[%s624_s1 + $0x50] sm:$0xf] }
   0x4   :  { %171 = vmatpush.bf16.msra.mxu0 %v396_v3  ;;  %425 = vmatpush.bf16.msra.mxu2 %v396_v3  ;;  %v392_v11 = vor.u32 %v421_v8, %v389_v9  ;;  %v420_v13 = vld [vmem:[%s624_s1 + $0x54] sm:$0xf0]  ;;  %v419_v14 = vld [vmem:[%s624_s1 + $0x54] sm:$0xf]  ;;  %v381_v15 = vld [vmem:[%s624_s1 + $0x58] sm:$0xf0] }
   0x5   :  { %220 = vmatpush.bf16.msra.mxu1 %v400_v7  ;;  %433 = vmatpush.bf16.msra.mxu3 %v400_v7  ;;  %v380_v16 = vor.u32 %v420_v13, %v379_v12  ;;  %v384_v17 = vor.u32 %v419_v14, %v381_v15  ;;  %v371_v18 = vld [vmem:[%s624_s1 + $0x40] sm:$0xf]  ;;  %v418_v19 = vld [vmem:[%s624_s1 + $0x44] sm:$0xf0]  ;;  %v417_v20 = vld [vmem:[%s624_s1 + $0x44] sm:$0xf] }
   0x6   :  { %v373_v21 = vld [vmem:[%s624_s1 + $0x48] sm:$0xf0]  ;;  %v372_v22 = vor.u32 %v418_v19, %v371_v18  ;;  %v363_v24 = vld [vmem:[%s624_s1 + $0x30] sm:$0xf]  ;;  %v416_v25 = vld [vmem:[%s624_s1 + $0x34] sm:$0xf0] }
   0x7   :  { %v376_v23 = vor.u32 %v417_v20, %v373_v21  ;;  %v415_v26 = vld [vmem:[%s624_s1 + $0x34] sm:$0xf]  ;;  %v365_v27 = vld [vmem:[%s624_s1 + $0x38] sm:$0xf0]  ;;  %v364_v28 = vor.u32 %v416_v25, %v363_v24  ;;  %v355_v30 = vld [vmem:[%s624_s1 + $0x20] sm:$0xf] }
   0x8   :  { %172 = vmatpush.bf16.msra.mxu0 %v388_v10  ;;  %426 = vmatpush.bf16.msra.mxu2 %v388_v10  ;;  %v368_v29 = vor.u32 %v415_v26, %v365_v27  ;;  %v414_v31 = vld [vmem:[%s624_s1 + $0x24] sm:$0xf0]  ;;  %v413_v32 = vld [vmem:[%s624_s1 + $0x24] sm:$0xf]  ;;  %v357_v33 = vld [vmem:[%s624_s1 + $0x28] sm:$0xf0] }
   0x9   :  { %221 = vmatpush.bf16.msra.mxu1 %v392_v11  ;;  %434 = vmatpush.bf16.msra.mxu3 %v392_v11  ;;  %v356_v34 = vor.u32 %v414_v31, %v355_v30  ;;  %v360_v35 = vor.u32 %v413_v32, %v357_v33  ;;  %v347_v36 = vld [vmem:[%s624_s1 + $0x10] sm:$0xf]  ;;  %v412_v37 = vld [vmem:[%s624_s1 + $0x14] sm:$0xf0]  ;;  %v411_v38 = vld [vmem:[%s624_s1 + $0x14] sm:$0xf] }
   0xa   :  { %v349_v39 = vld [vmem:[%s624_s1 + $0x18] sm:$0xf0]  ;;  %v348_v40 = vor.u32 %v412_v37, %v347_v36  ;;  %v339_v42 = vld [vmem:[%s624_s1] sm:$0xf]  ;;  %v410_v43 = vld [vmem:[%s624_s1 + $0x4] sm:$0xf0] }
   0xb   :  { %v352_v41 = vor.u32 %v411_v38, %v349_v39  ;;  %v409_v44 = vld [vmem:[%s624_s1 + $0x4] sm:$0xf]  ;;  %v341_v45 = vld [vmem:[%s624_s1 + $0x8] sm:$0xf0]  ;;  %v340_v46 = vor.u32 %v410_v43, %v339_v42  ;;  %v403_v52 = vld [vmem:[%s625_s0 + $0x10] sm:$0xff] }
   0xc   :  { %173 = vmatpush.bf16.msra.mxu0 %v380_v16  ;;  %427 = vmatpush.bf16.msra.mxu2 %v380_v16  ;;  %v344_v47 = vor.u32 %v409_v44, %v341_v45  ;;  %v401_v48 = vld [vmem:[%s625_s0] sm:$0xff]  ;;  %v402_v50 = vld [vmem:[%s625_s0 + $0x8] sm:$0xff]  ;;  %v407_v53 = vld [vmem:[%s625_s0 + $0x30] sm:$0xff] }
   0xd   :  { %222 = vmatpush.bf16.msra.mxu1 %v384_v17  ;;  %435 = vmatpush.bf16.msra.mxu3 %v384_v17  ;;  %v405_v49 = vld [vmem:[%s625_s0 + $0x20] sm:$0xff]  ;;  %v406_v51 = vld [vmem:[%s625_s0 + $0x28] sm:$0xff]  ;;  %v404_v54 = vld [vmem:[%s625_s0 + $0x18] sm:$0xff] }
   0xe   :  { %v408_v55 = vld [vmem:[%s625_s0 + $0x38] sm:$0xff] }
  0x10   :  { %174 = vmatpush.bf16.msra.mxu0 %v372_v22  ;;  %428 = vmatpush.bf16.msra.mxu2 %v372_v22 }
  0x11   :  { %223 = vmatpush.bf16.msra.mxu1 %v376_v23  ;;  %436 = vmatpush.bf16.msra.mxu3 %v376_v23 }
  0x14   :  { %175 = vmatpush.bf16.msra.mxu0 %v364_v28  ;;  %429 = vmatpush.bf16.msra.mxu2 %v364_v28 }
  0x15   :  { %224 = vmatpush.bf16.msra.mxu1 %v368_v29  ;;  %437 = vmatpush.bf16.msra.mxu3 %v368_v29 }
  0x18   :  { %176 = vmatpush.bf16.msra.mxu0 %v356_v34  ;;  %430 = vmatpush.bf16.msra.mxu2 %v356_v34 }
  0x19   :  { %225 = vmatpush.bf16.msra.mxu1 %v360_v35  ;;  %438 = vmatpush.bf16.msra.mxu3 %v360_v35 }
  0x1c   :  { %177 = vmatpush.bf16.msra.mxu0 %v348_v40  ;;  %431 = vmatpush.bf16.msra.mxu2 %v348_v40 }
  0x1d   :  { %226 = vmatpush.bf16.msra.mxu1 %v352_v41  ;;  %439 = vmatpush.bf16.msra.mxu3 %v352_v41 }
  0x20   :  { %178 = vmatpush.bf16.msra.mxu0 %v340_v46  ;;  %432 = vmatpush.bf16.msra.mxu2 %v340_v46 }
  0x21   :  { %227 = vmatpush.bf16.msra.mxu1 %v344_v47  ;;  %440 = vmatpush.bf16.msra.mxu3 %v344_v47 }
  0x23   :  { %179 = vmatmul.bf16.vlgmr.msra.gmra.mxu0 %v401_v48  ;;  %199 = vmatmul.bf16.vlgmr.msra.gmra.mxu2 %v405_v49 }
  0x24   :  { %228 = vmatmul.bf16.vlgmr.msra.gmra.mxu1 %v401_v48  ;;  %248 = vmatmul.bf16.vlgmr.msra.gmra.mxu3 %v405_v49 }
  0x33   :  { %184 = vmatmul.bf16.gmra.mxu0 %v402_v50  ;;  %204 = vmatmul.bf16.gmra.mxu2 %v406_v51 }
  0x34   :  { %233 = vmatmul.bf16.gmra.mxu1 %v402_v50  ;;  %253 = vmatmul.bf16.gmra.mxu3 %v406_v51 }
  0x43   :  { %189 = vmatmul.bf16.gmra.mxu0 %v403_v52  ;;  %209 = vmatmul.bf16.gmra.mxu2 %v407_v53 }
  0x44   :  { %238 = vmatmul.bf16.gmra.mxu1 %v403_v52  ;;  %258 = vmatmul.bf16.gmra.mxu3 %v407_v53 }
  0x53   :  { %194 = vmatmul.bf16.gmra.mxu0 %v404_v54  ;;  %214 = vmatmul.bf16.gmra.mxu2 %v408_v55 }
  0x54   :  { %243 = vmatmul.bf16.gmra.mxu1 %v404_v54  ;;  %263 = vmatmul.bf16.gmra.mxu3 %v408_v55 }
  0xa0   :  { %v180_v56 = vpop.f32.mrf.mxu0 }
  0xa1   :  { %v229_v57 = vpop.f32.mrf.mxu1 }
  0xa2   :  { %v269_v58 = vpack.c.bf16 %v229_v57, %v180_v56 }
  0xa4   :  { %285 = vst [vmem:[%s626_s2] sm:$0xff] %v269_v58 }
  0xa6   :  { %v200_v59 = vpop.f32.mrf.mxu2 }
  0xa7   :  { %v249_v60 = vpop.f32.mrf.mxu3 }
  0xa8   :  { %v277_v61 = vpack.c.bf16 %v249_v60, %v200_v59  ;;  %v182_v62 = vpop.f32.mrf.mxu0 }
  0xa9   :  { %v231_v63 = vpop.f32.mrf.mxu1 }
  0xaa   :  { %293 = vst [vmem:[%s626_s2 + $0x40] sm:$0xff] %v277_v61  ;;  %v270_v0 = vpack.c.bf16 %v231_v63, %v182_v62 }
  0xac   :  { %286 = vst [vmem:[%s626_s2 + $0x8] sm:$0xff] %v270_v0 }
  0xae   :  { %v202_v1 = vpop.f32.mrf.mxu2 }
  0xaf   :  { %v251_v2 = vpop.f32.mrf.mxu3 }
  0xb0   :  { %v278_v3 = vpack.c.bf16 %v251_v2, %v202_v1  ;;  %v185_v4 = vpop.f32.mrf.mxu0 }
  0xb1   :  { %v234_v5 = vpop.f32.mrf.mxu1 }
  0xb2   :  { %294 = vst [vmem:[%s626_s2 + $0x48] sm:$0xff] %v278_v3  ;;  %v271_v6 = vpack.c.bf16 %v234_v5, %v185_v4 }
  0xb4   :  { %287 = vst [vmem:[%s626_s2 + $0x10] sm:$0xff] %v271_v6 }
  0xb6   :  { %v205_v7 = vpop.f32.mrf.mxu2 }
  0xb7   :  { %v254_v8 = vpop.f32.mrf.mxu3 }
  0xb8   :  { %v279_v9 = vpack.c.bf16 %v254_v8, %v205_v7  ;;  %v187_v10 = vpop.f32.mrf.mxu0 }
  0xb9   :  { %v236_v11 = vpop.f32.mrf.mxu1 }
  0xba   :  { %295 = vst [vmem:[%s626_s2 + $0x50] sm:$0xff] %v279_v9  ;;  %v272_v12 = vpack.c.bf16 %v236_v11, %v187_v10 }
  0xbc   :  { %288 = vst [vmem:[%s626_s2 + $0x18] sm:$0xff] %v272_v12 }
  0xbe   :  { %v207_v13 = vpop.f32.mrf.mxu2 }
  0xbf   :  { %v256_v14 = vpop.f32.mrf.mxu3 }
  0xc0   :  { %v280_v15 = vpack.c.bf16 %v256_v14, %v207_v13  ;;  %v190_v16 = vpop.f32.mrf.mxu0 }
  0xc1   :  { %v239_v17 = vpop.f32.mrf.mxu1 }
  0xc2   :  { %296 = vst [vmem:[%s626_s2 + $0x58] sm:$0xff] %v280_v15  ;;  %v273_v18 = vpack.c.bf16 %v239_v17, %v190_v16 }
  0xc4   :  { %289 = vst [vmem:[%s626_s2 + $0x20] sm:$0xff] %v273_v18 }
  0xc6   :  { %v210_v19 = vpop.f32.mrf.mxu2 }
  0xc7   :  { %v259_v20 = vpop.f32.mrf.mxu3 }
  0xc8   :  { %v281_v21 = vpack.c.bf16 %v259_v20, %v210_v19  ;;  %v192_v22 = vpop.f32.mrf.mxu0 }
  0xc9   :  { %v241_v23 = vpop.f32.mrf.mxu1 }
  0xca   :  { %297 = vst [vmem:[%s626_s2 + $0x60] sm:$0xff] %v281_v21  ;;  %v274_v24 = vpack.c.bf16 %v241_v23, %v192_v22 }
  0xcc   :  { %290 = vst [vmem:[%s626_s2 + $0x28] sm:$0xff] %v274_v24 }
  0xce   :  { %v212_v25 = vpop.f32.mrf.mxu2 }
  0xcf   :  { %v261_v26 = vpop.f32.mrf.mxu3 }
  0xd0   :  { %v282_v27 = vpack.c.bf16 %v261_v26, %v212_v25  ;;  %v195_v28 = vpop.f32.mrf.mxu0 }
  0xd1   :  { %v244_v29 = vpop.f32.mrf.mxu1 }
  0xd2   :  { %298 = vst [vmem:[%s626_s2 + $0x68] sm:$0xff] %v282_v27  ;;  %v275_v30 = vpack.c.bf16 %v244_v29, %v195_v28 }
  0xd4   :  { %291 = vst [vmem:[%s626_s2 + $0x30] sm:$0xff] %v275_v30 }
  0xd6   :  { %v215_v31 = vpop.f32.mrf.mxu2 }
  0xd7   :  { %v264_v32 = vpop.f32.mrf.mxu3 }
  0xd8   :  { %v283_v33 = vpack.c.bf16 %v264_v32, %v215_v31  ;;  %v197_v34 = vpop.f32.mrf.mxu0 }
  0xd9   :  { %v246_v35 = vpop.f32.mrf.mxu1 }
  0xda   :  { %299 = vst [vmem:[%s626_s2 + $0x70] sm:$0xff] %v283_v33  ;;  %v276_v36 = vpack.c.bf16 %v246_v35, %v197_v34 }
  0xdc   :  { %292 = vst [vmem:[%s626_s2 + $0x38] sm:$0xff] %v276_v36 }
  0xde   :  { %v217_v37 = vpop.f32.mrf.mxu2 }
  0xdf   :  { %v266_v38 = vpop.f32.mrf.mxu3 }
  0xe0   :  { %v284_v39 = vpack.c.bf16 %v266_v38, %v217_v37 }
  0xe2   :  { %300 = vst [vmem:[%s626_s2 + $0x78] sm:$0xff] %v284_v39 }

// kernel: sage_forward.5
= control target key start
LH: loop header
LB: loop body
LE: loop exit
PB: predicated region body
PF: predicated region fallthrough
CT: control target
= control target key end

     0   :  { %v915_v32 = vmov 0.0   ;;  %s1114_s0 = inlined_call_operand.<no memory space> [shape: s32[1], index: 0, kind: input, shape index: {}]   ;;  %s1115_s1 = inlined_call_operand.<no memory space> [shape: s32[1], index: 1, kind: input, shape index: {}]   ;;  %s1116_s2 = inlined_call_operand.vmem [shape: s8[128,128], index: 2, kind: input, shape index: {}]   ;;  %s1117_s3 = inlined_call_operand.vmem [shape: bf16[128,256], index: 3, kind: input, shape index: {}, may-alias: {3,4}]   ;;  %s1118_s4 = inlined_call_operand.vmem [shape: bf16[128,256], index: 4, kind: input, shape index: {}, may-alias: {3,4}]   ;;  %s1119_s5 = inlined_call_operand.vmem [shape: f32[128,1], index: 5, kind: input, shape index: {}]   ;;  %s1120_s6 = inlined_call_operand.vmem [shape: bf16[128,128], index: 6, kind: output, shape index: {}]  }
   0x1   :  { %s791_s23 = sshll.u32 %s1114_s0, 7  ;;  %v739_v0 = vld [vmem:[%s1118_s4 + $0x4] sm:$0xf]  ;;  %p250_p0 = scmp.lt.s32.totalorder %s1114_s0, 0  ;;  %v740_v17 = vld [vmem:[%s1118_s4 + $0xc] sm:$0xf] }
   0x2   :  { %s961_s28 = scalar_lea.vmem %s1117_s3, %s791_s23  ;;  %152 = vst [vmem:[#allocation7] sm:$0xf] %v739_v0  ;;  %v741_v18 = vld [vmem:[%s1118_s4 + $0x14] sm:$0xf]  ;;  %v742_v19 = vld [vmem:[%s1118_s4 + $0x1c] sm:$0xf] }
   0x3   :  { %v47_v1 = vld [vmem:[%s961_s28] sm:$0xf]  ;;  %v49_v2 = vld [vmem:[%s961_s28 + $0x8] sm:$0xf]  ;;  %v51_v3 = vld [vmem:[%s961_s28 + $0x10] sm:$0xf] }
   0x4   :  { %48 = vst [vmem:[#allocation6] sm:$0xf] %v47_v1  ;;  %v53_v4 = vld [vmem:[%s961_s28 + $0x18] sm:$0xf]  ;;  %v55_v5 = vld [vmem:[%s961_s28 + $0x20] sm:$0xf] }
   0x5   :  { %50 = vst [vmem:[#allocation6 + $0x4] sm:$0xf] %v49_v2  ;;  %v57_v6 = vld [vmem:[%s961_s28 + $0x28] sm:$0xf]  ;;  %v59_v7 = vld [vmem:[%s961_s28 + $0x30] sm:$0xf] }
   0x6   :  { %52 = vst [vmem:[#allocation6 + $0x8] sm:$0xf] %v51_v3  ;;  %v61_v8 = vld [vmem:[%s961_s28 + $0x38] sm:$0xf]  ;;  %v63_v9 = vld [vmem:[%s961_s28 + $0x40] sm:$0xf] }
   0x7   :  { %54 = vst [vmem:[#allocation6 + $0xc] sm:$0xf] %v53_v4  ;;  %v65_v10 = vld [vmem:[%s961_s28 + $0x48] sm:$0xf]  ;;  %v67_v11 = vld [vmem:[%s961_s28 + $0x50] sm:$0xf] }
   0x8   :  { %56 = vst [vmem:[#allocation6 + $0x10] sm:$0xf] %v55_v5  ;;  %v69_v12 = vld [vmem:[%s961_s28 + $0x58] sm:$0xf]  ;;  %v71_v13 = vld [vmem:[%s961_s28 + $0x60] sm:$0xf] }
   0x9   :  { %58 = vst [vmem:[#allocation6 + $0x14] sm:$0xf] %v57_v6  ;;  %v73_v14 = vld [vmem:[%s961_s28 + $0x68] sm:$0xf]  ;;  %v75_v15 = vld [vmem:[%s961_s28 + $0x70] sm:$0xf] }
   0xa   :  { %60 = vst [vmem:[#allocation6 + $0x18] sm:$0xf] %v59_v7  ;;  %v77_v16 = vld [vmem:[%s961_s28 + $0x78] sm:$0xf]  ;;  %s1122_s0 = smov (!%p250_p0, %s1114_s0), 0  ;;  %p757_p1 = scmp.le.s32.totalorder %s1115_s1, 0 }
   0xb   :  { %62 = vst [vmem:[#allocation6 + $0x1c] sm:$0xf] %v61_v8  ;;  %s755_s12 = sshll.u32 %s1122_s0, 3  ;;  %v743_v20 = vld [vmem:[%s1118_s4 + $0x24] sm:$0xf] }
   0xc   :  { %64 = vst [vmem:[#allocation6 + $0x20] sm:$0xf] %v63_v9  ;;  %s997_s17 = scalar_lea.vmem %s1116_s2, %s755_s12  ;;  %v744_v21 = vld [vmem:[%s1118_s4 + $0x2c] sm:$0xf]  ;;  %v745_v22 = vld [vmem:[%s1118_s4 + $0x34] sm:$0xf] }
   0xd   :  { %66 = vst [vmem:[#allocation6 + $0x24] sm:$0xf] %v65_v10  ;;  %v746_v23 = vld [vmem:[%s1118_s4 + $0x3c] sm:$0xf]  ;;  %v747_v24 = vld [vmem:[%s1118_s4 + $0x44] sm:$0xf] }
   0xe   :  { %68 = vst [vmem:[#allocation6 + $0x28] sm:$0xf] %v67_v11  ;;  %v748_v25 = vld [vmem:[%s1118_s4 + $0x4c] sm:$0xf]  ;;  %v749_v26 = vld [vmem:[%s1118_s4 + $0x54] sm:$0xf] }
   0xf   :  { %70 = vst [vmem:[#allocation6 + $0x2c] sm:$0xf] %v69_v12  ;;  %v750_v27 = vld [vmem:[%s1118_s4 + $0x5c] sm:$0xf]  ;;  %v751_v28 = vld [vmem:[%s1118_s4 + $0x64] sm:$0xf] }
  0x10   :  { %72 = vst [vmem:[#allocation6 + $0x30] sm:$0xf] %v71_v13  ;;  %v752_v29 = vld [vmem:[%s1118_s4 + $0x6c] sm:$0xf]  ;;  %v753_v30 = vld [vmem:[%s1118_s4 + $0x74] sm:$0xf] }
  0x11   :  { %74 = vst [vmem:[#allocation6 + $0x34] sm:$0xf] %v73_v14  ;;  %v754_v31 = vld [vmem:[%s1118_s4 + $0x7c] sm:$0xf] }
  0x12   :  { %76 = vst [vmem:[#allocation6 + $0x38] sm:$0xf] %v75_v15 }
  0x13   :  { %78 = vst [vmem:[#allocation6 + $0x3c] sm:$0xf] %v77_v16 }
  0x14   :  { %154 = vst [vmem:[#allocation7 + $0x4] sm:$0xf] %v740_v17 }
  0x15   :  { %156 = vst [vmem:[#allocation7 + $0x8] sm:$0xf] %v741_v18 }
  0x16   :  { %158 = vst [vmem:[#allocation7 + $0xc] sm:$0xf] %v742_v19 }
  0x17   :  { %160 = vst [vmem:[#allocation7 + $0x10] sm:$0xf] %v743_v20 }
  0x18   :  { %162 = vst [vmem:[#allocation7 + $0x14] sm:$0xf] %v744_v21 }
  0x19   :  { %164 = vst [vmem:[#allocation7 + $0x18] sm:$0xf] %v745_v22 }
  0x1a   :  { %166 = vst [vmem:[#allocation7 + $0x1c] sm:$0xf] %v746_v23 }
  0x1b   :  { %168 = vst [vmem:[#allocation7 + $0x20] sm:$0xf] %v747_v24 }
  0x1c   :  { %170 = vst [vmem:[#allocation7 + $0x24] sm:$0xf] %v748_v25 }
  0x1d   :  { %172 = vst [vmem:[#allocation7 + $0x28] sm:$0xf] %v749_v26 }
  0x1e   :  { %174 = vst [vmem:[#allocation7 + $0x2c] sm:$0xf] %v750_v27 }
  0x1f   :  { %176 = vst [vmem:[#allocation7 + $0x30] sm:$0xf] %v751_v28 }
  0x20   :  { %178 = vst [vmem:[#allocation7 + $0x34] sm:$0xf] %v752_v29 }
  0x21   :  { %180 = vst [vmem:[#allocation7 + $0x38] sm:$0xf] %v753_v30 }
  0x22   :  { %182 = vst [vmem:[#allocation7 + $0x3c] sm:$0xf] %v754_v31 }
  0x23   :  { %263 = vst [vmem:[#allocation2 + $0x30] sm:$0xff] %v915_v32 }
  0x24   :  { %264 = vst [vmem:[#allocation2] sm:$0xff] %v915_v32 }
  0x25   :  { %265 = vst [vmem:[#allocation2 + $0x58] sm:$0xff] %v915_v32 }
  0x26   :  { %266 = vst [vmem:[#allocation2 + $0x18] sm:$0xff] %v915_v32 }
  0x27   :  { %267 = vst [vmem:[#allocation2 + $0x50] sm:$0xff] %v915_v32 }
  0x28   :  { %268 = vst [vmem:[#allocation2 + $0x68] sm:$0xff] %v915_v32 }
  0x29   :  { %269 = vst [vmem:[#allocation2 + $0x8] sm:$0xff] %v915_v32 }
  0x2a   :  { %270 = vst [vmem:[#allocation2 + $0x48] sm:$0xff] %v915_v32 }
  0x2b   :  { %271 = vst [vmem:[#allocation2 + $0x40] sm:$0xff] %v915_v32 }
  0x2c   :  { %272 = vst [vmem:[#allocation2 + $0x20] sm:$0xff] %v915_v32 }
  0x2d   :  { %273 = vst [vmem:[#allocation2 + $0x10] sm:$0xff] %v915_v32 }
  0x2e   :  { %274 = vst [vmem:[#allocation2 + $0x38] sm:$0xff] %v915_v32  ;;  %283 = sbr.rel (%p757_p1) target bundleno = 244 (0xf4), region = 107 }
  0x2f   :  { %275 = vst [vmem:[#allocation2 + $0x60] sm:$0xff] %v915_v32 }
  0x30   :  { %276 = vst [vmem:[#allocation2 + $0x70] sm:$0xff] %v915_v32 }
  0x31   :  { %277 = vst [vmem:[#allocation2 + $0x78] sm:$0xff] %v915_v32 }
  0x32   :  { %278 = vst [vmem:[#allocation2 + $0x28] sm:$0xff] %v915_v32 }
  0x33   :  { %v799_v33 = vld [vmem:[#allocation6 + $0x38] sm:$0xff]  ;;  %v798_v34 = vld [vmem:[#allocation6 + $0x30] sm:$0xff]  ;;  %v797_v35 = vld [vmem:[#allocation6 + $0x28] sm:$0xff] }
  0x34   :  { %408 = vmatpush.bf16.msra.mxu0 %v799_v33  ;;  %886 = vmatpush.bf16.msra.mxu1 %v799_v33  ;;  %v796_v36 = vld [vmem:[#allocation6 + $0x20] sm:$0xff]  ;;  %v795_v37 = vld [vmem:[#allocation6 + $0x18] sm:$0xff]  ;;  %v794_v38 = vld [vmem:[#allocation6 + $0x10] sm:$0xff] }
  0x35   :  { %887 = vmatpush.bf16.msra.mxu2 %v799_v33  ;;  %888 = vmatpush.bf16.msra.mxu3 %v799_v33  ;;  %v284_v39 = vld [vmem:[%s997_s17] sm:$0xff]  ;;  %v285_v40 = vld [vmem:[%s997_s17 + $0x8] sm:$0xff]  ;;  %v286_v41 = vld [vmem:[%s997_s17 + $0x10] sm:$0xff] }
  0x36   :  { %v287_v42 = vld [vmem:[%s997_s17 + $0x18] sm:$0xff]  ;;  %v288_v43 = vunpack.c.0.s8 %v284_v39  ;;  %v289_v44 = vunpack.c.1.s8 %v284_v39  ;;  %v292_v45 = vunpack.c.0.s8 %v285_v40  ;;  %v293_v46 = vunpack.c.1.s8 %v285_v40  ;;  %v793_v47 = vld [vmem:[#allocation6 + $0x8] sm:$0xff]  ;;  %v792_v56 = vld [vmem:[#allocation6] sm:$0xff] }
  0x37   :  { %v296_v48 = vunpack.c.0.s8 %v286_v41  ;;  %v297_v49 = vunpack.c.1.s8 %v286_v41  ;;  %v300_v50 = vunpack.c.0.s8 %v287_v42  ;;  %v301_v51 = vunpack.c.1.s8 %v287_v42  ;;  %v328_v21 = vld [vmem:[#allocation2 + $0x30] sm:$0xff]  ;;  %v336_v27 = vld [vmem:[#allocation2 + $0x40] sm:$0xff]  ;;  %v333_v30 = vld [vmem:[#allocation2 + $0x68] sm:$0xff] }
  0x38   :  { %409 = vmatpush.bf16.msra.mxu0 %v798_v34  ;;  %889 = vmatpush.bf16.msra.mxu1 %v798_v34  ;;  %v304_v52 = vcvt.s32.f32 %v288_v43  ;;  %v305_v53 = vcvt.s32.f32 %v289_v44  ;;  %v308_v54 = vcvt.s32.f32 %v292_v45  ;;  %v309_v55 = vcvt.s32.f32 %v293_v46  ;;  %v332_v22 = vld [vmem:[#allocation2 + $0x50] sm:$0xff]  ;;  %v340_v28 = vld [vmem:[#allocation2 + $0x60] sm:$0xff] }
  0x39   :  { %890 = vmatpush.bf16.msra.mxu2 %v798_v34  ;;  %891 = vmatpush.bf16.msra.mxu3 %v798_v34  ;;  %v312_v57 = vcvt.s32.f32 %v296_v48  ;;  %v313_v58 = vcvt.s32.f32 %v297_v49  ;;  %v316_v59 = vcvt.s32.f32 %v300_v50  ;;  %v317_v60 = vcvt.s32.f32 %v301_v51  ;;  %v329_v29 = vld [vmem:[#allocation2] sm:$0xff]  ;;  %v338_v51 = vld [vmem:[#allocation2 + $0x10] sm:$0xff] }
  0x3a   :  { %v320_v61 = vpack.c.bf16 %v305_v53, %v304_v52  ;;  %v322_v62 = vpack.c.bf16 %v309_v55, %v308_v54  ;;  %v290_v1 = vunpack.c.2.s8 %v284_v39  ;;  %v291_v2 = vunpack.c.3.s8 %v284_v39  ;;  %v337_v39 = vld [vmem:[#allocation2 + $0x20] sm:$0xff]  ;;  %v342_v52 = vld [vmem:[#allocation2 + $0x78] sm:$0xff]  ;;  %v335_v54 = vld [vmem:[#allocation2 + $0x48] sm:$0xff] }
  0x3b   :  { %v324_v63 = vpack.c.bf16 %v313_v58, %v312_v57  ;;  %v326_v0 = vpack.c.bf16 %v317_v60, %v316_v59  ;;  %v294_v3 = vunpack.c.2.s8 %v285_v40  ;;  %v295_v4 = vunpack.c.3.s8 %v285_v40  ;;  %v341_v40 = vld [vmem:[#allocation2 + $0x70] sm:$0xff]  ;;  %v331_v53 = vld [vmem:[#allocation2 + $0x18] sm:$0xff] }
  0x3c   :  { %410 = vmatpush.bf16.msra.mxu0 %v797_v35  ;;  %892 = vmatpush.bf16.msra.mxu1 %v797_v35  ;;  %v298_v5 = vunpack.c.2.s8 %v286_v41  ;;  %v299_v6 = vunpack.c.3.s8 %v286_v41  ;;  %v302_v7 = vunpack.c.2.s8 %v287_v42  ;;  %v303_v8 = vunpack.c.3.s8 %v287_v42  ;;  %v330_v41 = vld [vmem:[#allocation2 + $0x58] sm:$0xff]  ;;  %v334_v42 = vld [vmem:[#allocation2 + $0x8] sm:$0xff] }
  0x3d   :  { %893 = vmatpush.bf16.msra.mxu2 %v797_v35  ;;  %894 = vmatpush.bf16.msra.mxu3 %v797_v35  ;;  %v306_v9 = vcvt.s32.f32 %v290_v1  ;;  %v307_v10 = vcvt.s32.f32 %v291_v2  ;;  %v310_v11 = vcvt.s32.f32 %v294_v3  ;;  %v311_v12 = vcvt.s32.f32 %v295_v4 }
  0x3e   :  { %v314_v13 = vcvt.s32.f32 %v298_v5  ;;  %v315_v14 = vcvt.s32.f32 %v299_v6  ;;  %v318_v15 = vcvt.s32.f32 %v302_v7  ;;  %v319_v16 = vcvt.s32.f32 %v303_v8 }
  0x3f   :  { %v321_v17 = vpack.c.bf16 %v307_v10, %v306_v9  ;;  %v323_v18 = vpack.c.bf16 %v311_v12, %v310_v11 }
  0x40   :  { %411 = vmatpush.bf16.msra.mxu0 %v796_v36  ;;  %895 = vmatpush.bf16.msra.mxu1 %v796_v36  ;;  %v325_v19 = vpack.c.bf16 %v315_v14, %v314_v13  ;;  %v327_v20 = vpack.c.bf16 %v319_v16, %v318_v15 }
  0x41   :  { %896 = vmatpush.bf16.msra.mxu2 %v796_v36  ;;  %897 = vmatpush.bf16.msra.mxu3 %v796_v36 }
  0x44   :  { %412 = vmatpush.bf16.msra.mxu0 %v795_v37  ;;  %898 = vmatpush.bf16.msra.mxu1 %v795_v37 }
  0x45   :  { %899 = vmatpush.bf16.msra.mxu2 %v795_v37  ;;  %900 = vmatpush.bf16.msra.mxu3 %v795_v37 }
  0x48   :  { %413 = vmatpush.bf16.msra.mxu0 %v794_v38  ;;  %901 = vmatpush.bf16.msra.mxu1 %v794_v38 }
  0x49   :  { %902 = vmatpush.bf16.msra.mxu2 %v794_v38  ;;  %903 = vmatpush.bf16.msra.mxu3 %v794_v38 }
  0x4c   :  { %414 = vmatpush.bf16.msra.mxu0 %v793_v47  ;;  %904 = vmatpush.bf16.msra.mxu1 %v793_v47 }
  0x4d   :  { %905 = vmatpush.bf16.msra.mxu2 %v793_v47  ;;  %906 = vmatpush.bf16.msra.mxu3 %v793_v47 }
  0x50   :  { %415 = vmatpush.bf16.msra.mxu0 %v792_v56  ;;  %907 = vmatpush.bf16.msra.mxu1 %v792_v56 }
  0x51   :  { %908 = vmatpush.bf16.msra.mxu2 %v792_v56  ;;  %909 = vmatpush.bf16.msra.mxu3 %v792_v56 }
  0x53   :  { %416 = vmatmul.bf16.vlgmr.msra.gmra.mxu0 %v320_v61  ;;  %426 = vmatmul.bf16.vlgmr.msra.gmra.mxu1 %v322_v62 }
  0x54   :  { %436 = vmatmul.bf16.vlgmr.msra.gmra.mxu2 %v324_v63  ;;  %446 = vmatmul.bf16.vlgmr.msra.gmra.mxu3 %v326_v0  ;;  %v339_v63 = vld [vmem:[#allocation2 + $0x38] sm:$0xff]  ;;  %v343_v0 = vld [vmem:[#allocation2 + $0x28] sm:$0xff] }
  0x63   :  { %421 = vmatmul.bf16.gmra.mxu0 %v321_v17  ;;  %431 = vmatmul.bf16.gmra.mxu1 %v323_v18 }
  0x64   :  { %441 = vmatmul.bf16.gmra.mxu2 %v325_v19  ;;  %451 = vmatmul.bf16.gmra.mxu3 %v327_v20 }
  0xd0   :  { %v417_v23 = vpop.f32.mrf.mxu0  ;;  %v427_v24 = vpop.f32.mrf.mxu1 }
  0xd1   :  { %v457_v25 = vadd.f32 %v417_v23, %v328_v21  ;;  %v461_v26 = vadd.f32 %v427_v24, %v332_v22 }
  0xd3   :  { %473 = vst [vmem:[#allocation2 + $0x30] sm:$0xff] %v457_v25 }
  0xd4   :  { %477 = vst [vmem:[#allocation2 + $0x50] sm:$0xff] %v461_v26 }
  0xd7   :  { %v437_v31 = vpop.f32.mrf.mxu2  ;;  %v447_v32 = vpop.f32.mrf.mxu3 }
  0xd8   :  { %v465_v33 = vadd.f32 %v437_v31, %v336_v27  ;;  %v469_v34 = vadd.f32 %v447_v32, %v340_v28  ;;  %v419_v35 = vpop.f32.mrf.mxu0  ;;  %v429_v36 = vpop.f32.mrf.mxu1 }
  0xd9   :  { %v458_v37 = vadd.f32 %v419_v35, %v329_v29  ;;  %v462_v38 = vadd.f32 %v429_v36, %v333_v30 }
  0xda   :  { %481 = vst [vmem:[#allocation2 + $0x40] sm:$0xff] %v465_v33 }
  0xdb   :  { %485 = vst [vmem:[#allocation2 + $0x60] sm:$0xff] %v469_v34 }
  0xdc   :  { %474 = vst [vmem:[#allocation2] sm:$0xff] %v458_v37 }
  0xdd   :  { %478 = vst [vmem:[#allocation2 + $0x68] sm:$0xff] %v462_v38 }
  0xdf   :  { %v439_v43 = vpop.f32.mrf.mxu2  ;;  %v449_v44 = vpop.f32.mrf.mxu3 }
  0xe0   :  { %v466_v45 = vadd.f32 %v439_v43, %v337_v39  ;;  %v470_v46 = vadd.f32 %v449_v44, %v341_v40  ;;  %v422_v47 = vpop.f32.mrf.mxu0  ;;  %v432_v48 = vpop.f32.mrf.mxu1 }
  0xe1   :  { %v459_v49 = vadd.f32 %v422_v47, %v330_v41  ;;  %v463_v50 = vadd.f32 %v432_v48, %v334_v42 }
  0xe2   :  { %482 = vst [vmem:[#allocation2 + $0x20] sm:$0xff] %v466_v45 }
  0xe3   :  { %486 = vst [vmem:[#allocation2 + $0x70] sm:$0xff] %v470_v46 }
  0xe4   :  { %475 = vst [vmem:[#allocation2 + $0x58] sm:$0xff] %v459_v49 }
  0xe5   :  { %479 = vst [vmem:[#allocation2 + $0x8] sm:$0xff] %v463_v50 }
  0xe7   :  { %v442_v55 = vpop.f32.mrf.mxu2  ;;  %v452_v56 = vpop.f32.mrf.mxu3 }
  0xe8   :  { %v467_v57 = vadd.f32 %v442_v55, %v338_v51  ;;  %v471_v58 = vadd.f32 %v452_v56, %v342_v52  ;;  %v424_v59 = vpop.f32.mrf.mxu0  ;;  %v434_v60 = vpop.f32.mrf.mxu1 }
  0xe9   :  { %v460_v61 = vadd.f32 %v424_v59, %v331_v53  ;;  %v464_v62 = vadd.f32 %v434_v60, %v335_v54 }
  0xea   :  { %483 = vst [vmem:[#allocation2 + $0x10] sm:$0xff] %v467_v57 }
  0xeb   :  { %487 = vst [vmem:[#allocation2 + $0x78] sm:$0xff] %v471_v58 }
  0xec   :  { %476 = vst [vmem:[#allocation2 + $0x18] sm:$0xff] %v460_v61 }
  0xed   :  { %480 = vst [vmem:[#allocation2 + $0x48] sm:$0xff] %v464_v62 }
  0xef   :  { %v444_v1 = vpop.f32.mrf.mxu2  ;;  %v454_v2 = vpop.f32.mrf.mxu3 }
  0xf0   :  { %v468_v3 = vadd.f32 %v444_v1, %v339_v63  ;;  %v472_v4 = vadd.f32 %v454_v2, %v343_v0 }
  0xf2   :  { %484 = vst [vmem:[#allocation2 + $0x38] sm:$0xff] %v468_v3 }
  0xf3   :  { %488 = vst [vmem:[#allocation2 + $0x28] sm:$0xff] %v472_v4 }
  0xf4 PF:  { %v512_v5 = vld [vmem:[%s1119_s5 + $0x20] sm:$0xff]  ;;  %v510_v6 = vld [vmem:[%s1119_s5 + $0x10] sm:$0xff]  ;;  %v916_v8 = vmov 0   ;;  %v513_v9 = vld [vmem:[%s1119_s5 + $0x28] sm:$0xff] }
  0xf5   :  { %v508_v7 = vld [vmem:[%s1119_s5] sm:$0xff]  ;;  %914 = vset.pattern.permute.xlu2 %v916_v8  ;;  %913 = vset.pattern.permute.xlu1 %v916_v8  ;;  %v511_v10 = vld [vmem:[%s1119_s5 + $0x18] sm:$0xff]  ;;  %v509_v11 = vld [vmem:[%s1119_s5 + $0x8] sm:$0xff] }
  0xf6   :  { %912 = vset.pattern.permute.xlu0 %v916_v8  ;;  %546 = vperm.xlu2 %914, %v512_v5   ;;  %v516_v12 = vld [vmem:[%s1119_s5 + $0x40] sm:$0xff]  ;;  %v515_v13 = vld [vmem:[%s1119_s5 + $0x38] sm:$0xff]  ;;  %v514_v14 = vld [vmem:[%s1119_s5 + $0x30] sm:$0xff] }
  0xf7   :  { %536 = vperm.xlu1 %913, %v510_v6   ;;  %526 = vperm.xlu0 %912, %v508_v7   ;;  %v519_v15 = vld [vmem:[%s1119_s5 + $0x58] sm:$0xff]  ;;  %v518_v16 = vld [vmem:[%s1119_s5 + $0x50] sm:$0xff]  ;;  %v517_v17 = vld [vmem:[%s1119_s5 + $0x48] sm:$0xff] }
  0xf8   :  { %v522_v18 = vld [vmem:[%s1119_s5 + $0x70] sm:$0xff]  ;;  %v521_v19 = vld [vmem:[%s1119_s5 + $0x68] sm:$0xff]  ;;  %v520_v20 = vld [vmem:[%s1119_s5 + $0x60] sm:$0xff] }
  0xf9   :  { %v523_v21 = vld [vmem:[%s1119_s5 + $0x78] sm:$0xff]  ;;  %v873_v22 = vld [vmem:[#allocation7 + $0x10] sm:$0xff]   ;;  %v497_v27 = vld [vmem:[#allocation2 + $0x68] sm:$0xff] }
  0xfa   :  { %v496_v24 = vld [vmem:[#allocation2 + $0x50] sm:$0xff]  ;;  %v810_v25 = vunpack.c.l.bf16 %v873_v22  ;;  %v811_v29 = vunpack.c.h.bf16 %v873_v22  ;;  %v872_v36 = vld [vmem:[#allocation7 + $0x8] sm:$0xff]   ;;  %v494_v38 = vld [vmem:[#allocation2 + $0x58] sm:$0xff] }
  0xfb   :  { %v801_v40 = vld [vmem:[#allocation7] sm:$0xff]   ;;  %v492_v41 = vld [vmem:[#allocation2 + $0x30] sm:$0xff]  ;;  %v806_v42 = vunpack.c.l.bf16 %v872_v36  ;;  %v495_v46 = vld [vmem:[#allocation2 + $0x18] sm:$0xff]  ;;  %v807_v49 = vunpack.c.h.bf16 %v872_v36 }
  0xfc   :  { %v802_v44 = vunpack.c.l.bf16 %v801_v40  ;;  %v493_v47 = vld [vmem:[#allocation2] sm:$0xff]  ;;  %v803_v50 = vunpack.c.h.bf16 %v801_v40  ;;  %v874_v60 = vld [vmem:[#allocation7 + $0x18] sm:$0xff]   ;;  %v499_v0 = vld [vmem:[#allocation2 + $0x48] sm:$0xff] }
  0xfd   :  { %v498_v1 = vld [vmem:[#allocation2 + $0x8] sm:$0xff]  ;;  %v815_v4 = vunpack.c.h.bf16 %v874_v60  ;;  %v814_v5 = vunpack.c.l.bf16 %v874_v60  ;;  %v875_v8 = vld [vmem:[#allocation7 + $0x20] sm:$0xff]   ;;  %v877_v36 = vld [vmem:[#allocation7 + $0x30] sm:$0xff]  }
  0xfe   :  { %551 = vperm.xlu2 %914, %v513_v9   ;;  %v876_v9 = vld [vmem:[#allocation7 + $0x28] sm:$0xff]  }
  0xff   :  { %541 = vperm.xlu1 %913, %v511_v10   ;;  %531 = vperm.xlu0 %912, %v509_v11   ;;  %v507_v60 = vld [vmem:[#allocation2 + $0x28] sm:$0xff] }
 0x106   :  { %566 = vperm.xlu2 %914, %v516_v12   ;;  %v500_v12 = vld [vmem:[#allocation2 + $0x40] sm:$0xff] }
 0x107   :  { %561 = vperm.xlu1 %913, %v515_v13   ;;  %556 = vperm.xlu0 %912, %v514_v14   ;;  %v503_v13 = vld [vmem:[#allocation2 + $0x38] sm:$0xff] }
 0x10e   :  { %581 = vperm.xlu2 %914, %v519_v15  }
 0x10f   :  { %576 = vperm.xlu1 %913, %v518_v16   ;;  %571 = vperm.xlu0 %912, %v517_v17   ;;  %v818_v16 = vunpack.c.l.bf16 %v875_v8  ;;  %v823_v17 = vunpack.c.h.bf16 %v876_v9 }
 0x116   :  { %596 = vperm.xlu2 %914, %v522_v18  }
 0x117   :  { %591 = vperm.xlu1 %913, %v521_v19   ;;  %586 = vperm.xlu0 %912, %v520_v20  }
 0x11f   :  { %601 = vperm.xlu0 %912, %v523_v21  }
 0x150   :  { %v547_v23 = vpop.permute.xlu2 %546 }
 0x151   :  { %v608_v26 = vmul.f32 %v547_v23, %v496_v24  ;;  %v502_v23 = vld [vmem:[#allocation2 + $0x10] sm:$0xff]  ;;  %v501_v24 = vld [vmem:[#allocation2 + $0x20] sm:$0xff] }
 0x153   :  { %v656_v28 = vadd.f32 %v810_v25, %v608_v26  ;;  %v822_v26 = vunpack.c.l.bf16 %v876_v9 }
 0x155   :  { %v672_v32 = vmax.f32 %v656_v28, 0.0 }
 0x158   :  { %v552_v30 = vpop.permute.xlu2 %551 }
 0x159   :  { %v609_v31 = vmul.f32 %v552_v30, %v497_v27  ;;  %v819_v27 = vunpack.c.h.bf16 %v875_v8 }
 0x15b   :  { %v657_v33 = vadd.f32 %v811_v29, %v609_v31 }
 0x15d   :  { %v673_v34 = vmax.f32 %v657_v33, 0.0 }
 0x15f   :  { %v845_v35 = vpack.c.bf16 %v673_v34, %v672_v32 }
 0x160   :  { %v567_v56 = vpop.permute.xlu2 %566 }
 0x161   :  { %880 = vst [vmem:[%s1120_s6 + $0x10] sm:$0xff] %v845_v35   ;;  %v612_v19 = vmul.f32 %v567_v56, %v500_v12 }
 0x163   :  { %v660_v30 = vadd.f32 %v818_v16, %v612_v19 }
 0x168   :  { %v582_v18 = vpop.permute.xlu2 %581 }
 0x169   :  { %v537_v37 = vpop.permute.xlu1 %536  ;;  %v527_v39 = vpop.permute.xlu0 %526  ;;  %v615_v20 = vmul.f32 %v582_v18, %v503_v13 }
 0x16a   :  { %v606_v43 = vmul.f32 %v537_v37, %v494_v38  ;;  %v604_v45 = vmul.f32 %v527_v39, %v492_v41  ;;  %v676_v37 = vmax.f32 %v660_v30, 0.0  ;;  %v505_v41 = vld [vmem:[#allocation2 + $0x70] sm:$0xff] }
 0x16b   :  { %v663_v31 = vadd.f32 %v823_v17, %v615_v20 }
 0x16c   :  { %v654_v48 = vadd.f32 %v806_v42, %v606_v43  ;;  %v652_v53 = vadd.f32 %v802_v44, %v604_v45  ;;  %v504_v42 = vld [vmem:[#allocation2 + $0x60] sm:$0xff]  ;;  %v827_v45 = vunpack.c.h.bf16 %v877_v36 }
 0x16d   :  { %v679_v38 = vmax.f32 %v663_v31, 0.0 }
 0x16e   :  { %v670_v57 = vmax.f32 %v654_v48, 0.0  ;;  %v668_v61 = vmax.f32 %v652_v53, 0.0  ;;  %v506_v53 = vld [vmem:[#allocation2 + $0x78] sm:$0xff] }
 0x171   :  { %v542_v51 = vpop.permute.xlu1 %541  ;;  %v532_v52 = vpop.permute.xlu0 %531 }
 0x172   :  { %v607_v54 = vmul.f32 %v542_v51, %v495_v46  ;;  %v605_v55 = vmul.f32 %v532_v52, %v493_v47  ;;  %v826_v46 = vunpack.c.l.bf16 %v877_v36  ;;  %v878_v51 = vld [vmem:[#allocation7 + $0x38] sm:$0xff]   ;;  %v597_v52 = vpop.permute.xlu2 %596 }
 0x173   :  { %v830_v56 = vunpack.c.l.bf16 %v878_v51 }
 0x174   :  { %v655_v58 = vadd.f32 %v807_v49, %v607_v54  ;;  %v653_v59 = vadd.f32 %v803_v50, %v605_v55 }
 0x176   :  { %v671_v62 = vmax.f32 %v655_v58, 0.0  ;;  %v669_v63 = vmax.f32 %v653_v59, 0.0 }
 0x178   :  { %v840_v2 = vpack.c.bf16 %v671_v62, %v670_v57  ;;  %v835_v3 = vpack.c.bf16 %v669_v63, %v668_v61  ;;  %v618_v57 = vmul.f32 %v597_v52, %v506_v53  ;;  %v831_v62 = vunpack.c.h.bf16 %v878_v51 }
 0x179   :  { %v562_v6 = vpop.permute.xlu1 %561  ;;  %v557_v7 = vpop.permute.xlu0 %556 }
 0x17a   :  { %879 = vst [vmem:[%s1120_s6 + $0x8] sm:$0xff] %v840_v2   ;;  %v611_v10 = vmul.f32 %v562_v6, %v499_v0  ;;  %v610_v11 = vmul.f32 %v557_v7, %v498_v1  ;;  %v666_v0 = vadd.f32 %v830_v56, %v618_v57 }
 0x17b   :  { %836 = vst [vmem:[%s1120_s6] sm:$0xff] %v835_v3  }
 0x17c   :  { %v659_v14 = vadd.f32 %v815_v4, %v611_v10  ;;  %v658_v15 = vadd.f32 %v814_v5, %v610_v11  ;;  %v682_v3 = vmax.f32 %v666_v0, 0.0 }
 0x17e   :  { %v675_v21 = vmax.f32 %v659_v14, 0.0  ;;  %v674_v22 = vmax.f32 %v658_v15, 0.0 }
 0x180   :  { %v850_v25 = vpack.c.bf16 %v675_v21, %v674_v22 }
 0x181   :  { %v577_v28 = vpop.permute.xlu1 %576  ;;  %v572_v29 = vpop.permute.xlu0 %571 }
 0x182   :  { %881 = vst [vmem:[%s1120_s6 + $0x18] sm:$0xff] %v850_v25   ;;  %v614_v32 = vmul.f32 %v577_v28, %v502_v23  ;;  %v613_v33 = vmul.f32 %v572_v29, %v501_v24 }
 0x184   :  { %v662_v34 = vadd.f32 %v822_v26, %v614_v32  ;;  %v661_v35 = vadd.f32 %v819_v27, %v613_v33 }
 0x186   :  { %v678_v39 = vmax.f32 %v662_v34, 0.0  ;;  %v677_v40 = vmax.f32 %v661_v35, 0.0 }
 0x188   :  { %v860_v43 = vpack.c.bf16 %v679_v38, %v678_v39  ;;  %v855_v44 = vpack.c.bf16 %v677_v40, %v676_v37 }
 0x189   :  { %v592_v47 = vpop.permute.xlu1 %591  ;;  %v587_v48 = vpop.permute.xlu0 %586 }
 0x18a   :  { %883 = vst [vmem:[%s1120_s6 + $0x28] sm:$0xff] %v860_v43   ;;  %v617_v49 = vmul.f32 %v592_v47, %v505_v41  ;;  %v616_v50 = vmul.f32 %v587_v48, %v504_v42 }
 0x18b   :  { %882 = vst [vmem:[%s1120_s6 + $0x20] sm:$0xff] %v855_v44  }
 0x18c   :  { %v665_v54 = vadd.f32 %v827_v45, %v617_v49  ;;  %v664_v55 = vadd.f32 %v826_v46, %v616_v50 }
 0x18e   :  { %v681_v58 = vmax.f32 %v665_v54, 0.0  ;;  %v680_v59 = vmax.f32 %v664_v55, 0.0 }
 0x190   :  { %v865_v61 = vpack.c.bf16 %v681_v58, %v680_v59 }
 0x191   :  { %v602_v63 = vpop.permute.xlu0 %601 }
 0x192   :  { %884 = vst [vmem:[%s1120_s6 + $0x30] sm:$0xff] %v865_v61   ;;  %v619_v1 = vmul.f32 %v602_v63, %v507_v60 }
 0x194   :  { %v667_v2 = vadd.f32 %v831_v62, %v619_v1 }
 0x196   :  { %v683_v4 = vmax.f32 %v667_v2, 0.0 }
 0x198   :  { %v870_v5 = vpack.c.bf16 %v683_v4, %v682_v3 }
 0x19a   :  { %885 = vst [vmem:[%s1120_s6 + $0x38] sm:$0xff] %v870_v5  }

// kernel: sage_forward.7
= control target key start
LH: loop header
LB: loop body
LE: loop exit
PB: predicated region body
PF: predicated region fallthrough
CT: control target
= control target key end

     0   :  { %13 = vsyncpa [#allocation9], 0  ;;  %v1120_v32 = vmov 0.0   ;;  %s1445_s0 = inlined_call_operand.<no memory space> [shape: s32[1], index: 0, kind: input, shape index: {}]   ;;  %s1446_s1 = inlined_call_operand.<no memory space> [shape: s32[1], index: 1, kind: input, shape index: {}]   ;;  %s1447_s2 = inlined_call_operand.vmem [shape: s8[128,128], index: 2, kind: input, shape index: {}]   ;;  %s1448_s3 = inlined_call_operand.vmem [shape: bf16[128,256], index: 3, kind: input, shape index: {}, may-alias: {3,4}]   ;;  %s1449_s4 = inlined_call_operand.vmem [shape: bf16[128,256], index: 4, kind: input, shape index: {}, may-alias: {3,4}]   ;;  %s1450_s5 = inlined_call_operand.vmem [shape: f32[128,1], index: 5, kind: input, shape index: {}]   ;;  %s1451_s6 = inlined_call_operand.hbm [shape: f32[128,128], index: 6, kind: output, shape index: {}]  }
   0x1   :  { %s950_s23 = sshll.u32 %s1445_s0, 7  ;;  %v898_v0 = vld [vmem:[%s1449_s4 + $0x4] sm:$0xf]  ;;  %p251_p0 = scmp.lt.s32.totalorder %s1445_s0, 0  ;;  %v899_v17 = vld [vmem:[%s1449_s4 + $0xc] sm:$0xf] }
   0x2   :  { %s1169_s28 = scalar_lea.vmem %s1448_s3, %s950_s23  ;;  %153 = vst [vmem:[#allocation7] sm:$0xf] %v898_v0  ;;  %v900_v18 = vld [vmem:[%s1449_s4 + $0x14] sm:$0xf]  ;;  %v901_v19 = vld [vmem:[%s1449_s4 + $0x1c] sm:$0xf] }
   0x3   :  { %v48_v1 = vld [vmem:[%s1169_s28] sm:$0xf]  ;;  %v50_v2 = vld [vmem:[%s1169_s28 + $0x8] sm:$0xf]  ;;  %v52_v3 = vld [vmem:[%s1169_s28 + $0x10] sm:$0xf] }
   0x4   :  { %49 = vst [vmem:[#allocation6] sm:$0xf] %v48_v1  ;;  %v54_v4 = vld [vmem:[%s1169_s28 + $0x18] sm:$0xf]  ;;  %v56_v5 = vld [vmem:[%s1169_s28 + $0x20] sm:$0xf] }
   0x5   :  { %51 = vst [vmem:[#allocation6 + $0x4] sm:$0xf] %v50_v2  ;;  %v58_v6 = vld [vmem:[%s1169_s28 + $0x28] sm:$0xf]  ;;  %v60_v7 = vld [vmem:[%s1169_s28 + $0x30] sm:$0xf] }
   0x6   :  { %53 = vst [vmem:[#allocation6 + $0x8] sm:$0xf] %v52_v3  ;;  %v62_v8 = vld [vmem:[%s1169_s28 + $0x38] sm:$0xf]  ;;  %v64_v9 = vld [vmem:[%s1169_s28 + $0x40] sm:$0xf] }
   0x7   :  { %55 = vst [vmem:[#allocation6 + $0xc] sm:$0xf] %v54_v4  ;;  %v66_v10 = vld [vmem:[%s1169_s28 + $0x48] sm:$0xf]  ;;  %v68_v11 = vld [vmem:[%s1169_s28 + $0x50] sm:$0xf] }
   0x8   :  { %57 = vst [vmem:[#allocation6 + $0x10] sm:$0xf] %v56_v5  ;;  %v70_v12 = vld [vmem:[%s1169_s28 + $0x58] sm:$0xf]  ;;  %v72_v13 = vld [vmem:[%s1169_s28 + $0x60] sm:$0xf] }
   0x9   :  { %59 = vst [vmem:[#allocation6 + $0x14] sm:$0xf] %v58_v6  ;;  %v74_v14 = vld [vmem:[%s1169_s28 + $0x68] sm:$0xf]  ;;  %v76_v15 = vld [vmem:[%s1169_s28 + $0x70] sm:$0xf] }
   0xa   :  { %61 = vst [vmem:[#allocation6 + $0x18] sm:$0xf] %v60_v7  ;;  %v78_v16 = vld [vmem:[%s1169_s28 + $0x78] sm:$0xf]  ;;  %s1453_s0 = smov (!%p251_p0, %s1445_s0), 0  ;;  %p916_p1 = scmp.le.s32.totalorder %s1446_s1, 0 }
   0xb   :  { %63 = vst [vmem:[#allocation6 + $0x1c] sm:$0xf] %v62_v8  ;;  %s914_s14 = sshll.u32 %s1453_s0, 3  ;;  %v902_v20 = vld [vmem:[%s1449_s4 + $0x24] sm:$0xf] }
   0xc   :  { %65 = vst [vmem:[#allocation6 + $0x20] sm:$0xf] %v64_v9  ;;  %s1208_s19 = scalar_lea.vmem %s1447_s2, %s914_s14  ;;  %v903_v21 = vld [vmem:[%s1449_s4 + $0x2c] sm:$0xf]  ;;  %v904_v22 = vld [vmem:[%s1449_s4 + $0x34] sm:$0xf] }
   0xd   :  { %67 = vst [vmem:[#allocation6 + $0x24] sm:$0xf] %v66_v10  ;;  %v905_v23 = vld [vmem:[%s1449_s4 + $0x3c] sm:$0xf]  ;;  %v906_v24 = vld [vmem:[%s1449_s4 + $0x44] sm:$0xf] }
   0xe   :  { %69 = vst [vmem:[#allocation6 + $0x28] sm:$0xf] %v68_v11  ;;  %v907_v25 = vld [vmem:[%s1449_s4 + $0x4c] sm:$0xf]  ;;  %v908_v26 = vld [vmem:[%s1449_s4 + $0x54] sm:$0xf] }
   0xf   :  { %71 = vst [vmem:[#allocation6 + $0x2c] sm:$0xf] %v70_v12  ;;  %v909_v27 = vld [vmem:[%s1449_s4 + $0x5c] sm:$0xf]  ;;  %v910_v28 = vld [vmem:[%s1449_s4 + $0x64] sm:$0xf] }
  0x10   :  { %73 = vst [vmem:[#allocation6 + $0x30] sm:$0xf] %v72_v13  ;;  %v911_v29 = vld [vmem:[%s1449_s4 + $0x6c] sm:$0xf]  ;;  %v912_v30 = vld [vmem:[%s1449_s4 + $0x74] sm:$0xf] }
  0x11   :  { %75 = vst [vmem:[#allocation6 + $0x34] sm:$0xf] %v74_v14  ;;  %v913_v31 = vld [vmem:[%s1449_s4 + $0x7c] sm:$0xf] }
  0x12   :  { %77 = vst [vmem:[#allocation6 + $0x38] sm:$0xf] %v76_v15 }
  0x13   :  { %79 = vst [vmem:[#allocation6 + $0x3c] sm:$0xf] %v78_v16 }
  0x14   :  { %155 = vst [vmem:[#allocation7 + $0x4] sm:$0xf] %v899_v17 }
  0x15   :  { %157 = vst [vmem:[#allocation7 + $0x8] sm:$0xf] %v900_v18 }
  0x16   :  { %159 = vst [vmem:[#allocation7 + $0xc] sm:$0xf] %v901_v19 }
  0x17   :  { %161 = vst [vmem:[#allocation7 + $0x10] sm:$0xf] %v902_v20 }
  0x18   :  { %163 = vst [vmem:[#allocation7 + $0x14] sm:$0xf] %v903_v21 }
  0x19   :  { %165 = vst [vmem:[#allocation7 + $0x18] sm:$0xf] %v904_v22 }
  0x1a   :  { %167 = vst [vmem:[#allocation7 + $0x1c] sm:$0xf] %v905_v23 }
  0x1b   :  { %169 = vst [vmem:[#allocation7 + $0x20] sm:$0xf] %v906_v24 }
  0x1c   :  { %171 = vst [vmem:[#allocation7 + $0x24] sm:$0xf] %v907_v25 }
  0x1d   :  { %173 = vst [vmem:[#allocation7 + $0x28] sm:$0xf] %v908_v26 }
  0x1e   :  { %175 = vst [vmem:[#allocation7 + $0x2c] sm:$0xf] %v909_v27 }
  0x1f   :  { %177 = vst [vmem:[#allocation7 + $0x30] sm:$0xf] %v910_v28 }
  0x20   :  { %179 = vst [vmem:[#allocation7 + $0x34] sm:$0xf] %v911_v29 }
  0x21   :  { %181 = vst [vmem:[#allocation7 + $0x38] sm:$0xf] %v912_v30 }
  0x22   :  { %183 = vst [vmem:[#allocation7 + $0x3c] sm:$0xf] %v913_v31 }
  0x23   :  { %264 = vst [vmem:[#allocation2 + $0x30] sm:$0xff] %v1120_v32 }
  0x24   :  { %265 = vst [vmem:[#allocation2] sm:$0xff] %v1120_v32 }
  0x25   :  { %266 = vst [vmem:[#allocation2 + $0x58] sm:$0xff] %v1120_v32 }
  0x26   :  { %267 = vst [vmem:[#allocation2 + $0x18] sm:$0xff] %v1120_v32 }
  0x27   :  { %268 = vst [vmem:[#allocation2 + $0x50] sm:$0xff] %v1120_v32 }
  0x28   :  { %269 = vst [vmem:[#allocation2 + $0x68] sm:$0xff] %v1120_v32 }
  0x29   :  { %270 = vst [vmem:[#allocation2 + $0x8] sm:$0xff] %v1120_v32 }
  0x2a   :  { %271 = vst [vmem:[#allocation2 + $0x48] sm:$0xff] %v1120_v32 }
  0x2b   :  { %272 = vst [vmem:[#allocation2 + $0x40] sm:$0xff] %v1120_v32 }
  0x2c   :  { %273 = vst [vmem:[#allocation2 + $0x20] sm:$0xff] %v1120_v32 }
  0x2d   :  { %274 = vst [vmem:[#allocation2 + $0x10] sm:$0xff] %v1120_v32 }
  0x2e   :  { %275 = vst [vmem:[#allocation2 + $0x38] sm:$0xff] %v1120_v32  ;;  %284 = sbr.rel (%p916_p1) target bundleno = 244 (0xf4), region = 107 }
  0x2f   :  { %276 = vst [vmem:[#allocation2 + $0x60] sm:$0xff] %v1120_v32 }
  0x30   :  { %277 = vst [vmem:[#allocation2 + $0x70] sm:$0xff] %v1120_v32 }
  0x31   :  { %278 = vst [vmem:[#allocation2 + $0x78] sm:$0xff] %v1120_v32 }
  0x32   :  { %279 = vst [vmem:[#allocation2 + $0x28] sm:$0xff] %v1120_v32 }
  0x33   :  { %v958_v33 = vld [vmem:[#allocation6 + $0x38] sm:$0xff]  ;;  %v957_v34 = vld [vmem:[#allocation6 + $0x30] sm:$0xff]  ;;  %v956_v35 = vld [vmem:[#allocation6 + $0x28] sm:$0xff] }
  0x34   :  { %409 = vmatpush.bf16.msra.mxu0 %v958_v33  ;;  %998 = vmatpush.bf16.msra.mxu1 %v958_v33  ;;  %v955_v36 = vld [vmem:[#allocation6 + $0x20] sm:$0xff]  ;;  %v954_v37 = vld [vmem:[#allocation6 + $0x18] sm:$0xff]  ;;  %v953_v38 = vld [vmem:[#allocation6 + $0x10] sm:$0xff] }
  0x35   :  { %999 = vmatpush.bf16.msra.mxu2 %v958_v33  ;;  %1000 = vmatpush.bf16.msra.mxu3 %v958_v33  ;;  %v285_v39 = vld [vmem:[%s1208_s19] sm:$0xff]  ;;  %v286_v40 = vld [vmem:[%s1208_s19 + $0x8] sm:$0xff]  ;;  %v287_v41 = vld [vmem:[%s1208_s19 + $0x10] sm:$0xff] }
  0x36   :  { %v288_v42 = vld [vmem:[%s1208_s19 + $0x18] sm:$0xff]  ;;  %v289_v43 = vunpack.c.0.s8 %v285_v39  ;;  %v290_v44 = vunpack.c.1.s8 %v285_v39  ;;  %v293_v45 = vunpack.c.0.s8 %v286_v40  ;;  %v294_v46 = vunpack.c.1.s8 %v286_v40  ;;  %v952_v47 = vld [vmem:[#allocation6 + $0x8] sm:$0xff]  ;;  %v951_v56 = vld [vmem:[#allocation6] sm:$0xff] }
  0x37   :  { %v297_v48 = vunpack.c.0.s8 %v287_v41  ;;  %v298_v49 = vunpack.c.1.s8 %v287_v41  ;;  %v301_v50 = vunpack.c.0.s8 %v288_v42  ;;  %v302_v51 = vunpack.c.1.s8 %v288_v42  ;;  %v329_v21 = vld [vmem:[#allocation2 + $0x30] sm:$0xff]  ;;  %v337_v27 = vld [vmem:[#allocation2 + $0x40] sm:$0xff]  ;;  %v334_v30 = vld [vmem:[#allocation2 + $0x68] sm:$0xff] }
  0x38   :  { %410 = vmatpush.bf16.msra.mxu0 %v957_v34  ;;  %1001 = vmatpush.bf16.msra.mxu1 %v957_v34  ;;  %v305_v52 = vcvt.s32.f32 %v289_v43  ;;  %v306_v53 = vcvt.s32.f32 %v290_v44  ;;  %v309_v54 = vcvt.s32.f32 %v293_v45  ;;  %v310_v55 = vcvt.s32.f32 %v294_v46  ;;  %v333_v22 = vld [vmem:[#allocation2 + $0x50] sm:$0xff]  ;;  %v341_v28 = vld [vmem:[#allocation2 + $0x60] sm:$0xff] }
  0x39   :  { %1002 = vmatpush.bf16.msra.mxu2 %v957_v34  ;;  %1003 = vmatpush.bf16.msra.mxu3 %v957_v34  ;;  %v313_v57 = vcvt.s32.f32 %v297_v48  ;;  %v314_v58 = vcvt.s32.f32 %v298_v49  ;;  %v317_v59 = vcvt.s32.f32 %v301_v50  ;;  %v318_v60 = vcvt.s32.f32 %v302_v51  ;;  %v330_v29 = vld [vmem:[#allocation2] sm:$0xff]  ;;  %v339_v51 = vld [vmem:[#allocation2 + $0x10] sm:$0xff] }
  0x3a   :  { %v321_v61 = vpack.c.bf16 %v306_v53, %v305_v52  ;;  %v323_v62 = vpack.c.bf16 %v310_v55, %v309_v54  ;;  %v291_v1 = vunpack.c.2.s8 %v285_v39  ;;  %v292_v2 = vunpack.c.3.s8 %v285_v39  ;;  %v338_v39 = vld [vmem:[#allocation2 + $0x20] sm:$0xff]  ;;  %v343_v52 = vld [vmem:[#allocation2 + $0x78] sm:$0xff]  ;;  %v336_v54 = vld [vmem:[#allocation2 + $0x48] sm:$0xff] }
  0x3b   :  { %v325_v63 = vpack.c.bf16 %v314_v58, %v313_v57  ;;  %v327_v0 = vpack.c.bf16 %v318_v60, %v317_v59  ;;  %v295_v3 = vunpack.c.2.s8 %v286_v40  ;;  %v296_v4 = vunpack.c.3.s8 %v286_v40  ;;  %v342_v40 = vld [vmem:[#allocation2 + $0x70] sm:$0xff]  ;;  %v332_v53 = vld [vmem:[#allocation2 + $0x18] sm:$0xff] }
  0x3c   :  { %411 = vmatpush.bf16.msra.mxu0 %v956_v35  ;;  %1004 = vmatpush.bf16.msra.mxu1 %v956_v35  ;;  %v299_v5 = vunpack.c.2.s8 %v287_v41  ;;  %v300_v6 = vunpack.c.3.s8 %v287_v41  ;;  %v303_v7 = vunpack.c.2.s8 %v288_v42  ;;  %v304_v8 = vunpack.c.3.s8 %v288_v42  ;;  %v331_v41 = vld [vmem:[#allocation2 + $0x58] sm:$0xff]  ;;  %v335_v42 = vld [vmem:[#allocation2 + $0x8] sm:$0xff] }
  0x3d   :  { %1005 = vmatpush.bf16.msra.mxu2 %v956_v35  ;;  %1006 = vmatpush.bf16.msra.mxu3 %v956_v35  ;;  %v307_v9 = vcvt.s32.f32 %v291_v1  ;;  %v308_v10 = vcvt.s32.f32 %v292_v2  ;;  %v311_v11 = vcvt.s32.f32 %v295_v3  ;;  %v312_v12 = vcvt.s32.f32 %v296_v4 }
  0x3e   :  { %v315_v13 = vcvt.s32.f32 %v299_v5  ;;  %v316_v14 = vcvt.s32.f32 %v300_v6  ;;  %v319_v15 = vcvt.s32.f32 %v303_v7  ;;  %v320_v16 = vcvt.s32.f32 %v304_v8 }
  0x3f   :  { %v322_v17 = vpack.c.bf16 %v308_v10, %v307_v9  ;;  %v324_v18 = vpack.c.bf16 %v312_v12, %v311_v11 }
  0x40   :  { %412 = vmatpush.bf16.msra.mxu0 %v955_v36  ;;  %1007 = vmatpush.bf16.msra.mxu1 %v955_v36  ;;  %v326_v19 = vpack.c.bf16 %v316_v14, %v315_v13  ;;  %v328_v20 = vpack.c.bf16 %v320_v16, %v319_v15 }
  0x41   :  { %1008 = vmatpush.bf16.msra.mxu2 %v955_v36  ;;  %1009 = vmatpush.bf16.msra.mxu3 %v955_v36 }
  0x44   :  { %413 = vmatpush.bf16.msra.mxu0 %v954_v37  ;;  %1010 = vmatpush.bf16.msra.mxu1 %v954_v37 }
  0x45   :  { %1011 = vmatpush.bf16.msra.mxu2 %v954_v37  ;;  %1012 = vmatpush.bf16.msra.mxu3 %v954_v37 }
  0x48   :  { %414 = vmatpush.bf16.msra.mxu0 %v953_v38  ;;  %1013 = vmatpush.bf16.msra.mxu1 %v953_v38 }
  0x49   :  { %1014 = vmatpush.bf16.msra.mxu2 %v953_v38  ;;  %1015 = vmatpush.bf16.msra.mxu3 %v953_v38 }
  0x4c   :  { %415 = vmatpush.bf16.msra.mxu0 %v952_v47  ;;  %1016 = vmatpush.bf16.msra.mxu1 %v952_v47 }
  0x4d   :  { %1017 = vmatpush.bf16.msra.mxu2 %v952_v47  ;;  %1018 = vmatpush.bf16.msra.mxu3 %v952_v47 }
  0x50   :  { %416 = vmatpush.bf16.msra.mxu0 %v951_v56  ;;  %1019 = vmatpush.bf16.msra.mxu1 %v951_v56 }
  0x51   :  { %1020 = vmatpush.bf16.msra.mxu2 %v951_v56  ;;  %1021 = vmatpush.bf16.msra.mxu3 %v951_v56 }
  0x53   :  { %417 = vmatmul.bf16.vlgmr.msra.gmra.mxu0 %v321_v61  ;;  %427 = vmatmul.bf16.vlgmr.msra.gmra.mxu1 %v323_v62 }
  0x54   :  { %437 = vmatmul.bf16.vlgmr.msra.gmra.mxu2 %v325_v63  ;;  %447 = vmatmul.bf16.vlgmr.msra.gmra.mxu3 %v327_v0  ;;  %v340_v63 = vld [vmem:[#allocation2 + $0x38] sm:$0xff]  ;;  %v344_v0 = vld [vmem:[#allocation2 + $0x28] sm:$0xff] }
  0x63   :  { %422 = vmatmul.bf16.gmra.mxu0 %v322_v17  ;;  %432 = vmatmul.bf16.gmra.mxu1 %v324_v18 }
  0x64   :  { %442 = vmatmul.bf16.gmra.mxu2 %v326_v19  ;;  %452 = vmatmul.bf16.gmra.mxu3 %v328_v20 }
  0xd0   :  { %v418_v23 = vpop.f32.mrf.mxu0  ;;  %v428_v24 = vpop.f32.mrf.mxu1 }
  0xd1   :  { %v458_v25 = vadd.f32 %v418_v23, %v329_v21  ;;  %v462_v26 = vadd.f32 %v428_v24, %v333_v22 }
  0xd3   :  { %474 = vst [vmem:[#allocation2 + $0x30] sm:$0xff] %v458_v25 }
  0xd4   :  { %478 = vst [vmem:[#allocation2 + $0x50] sm:$0xff] %v462_v26 }
  0xd7   :  { %v438_v31 = vpop.f32.mrf.mxu2  ;;  %v448_v32 = vpop.f32.mrf.mxu3 }
  0xd8   :  { %v466_v33 = vadd.f32 %v438_v31, %v337_v27  ;;  %v470_v34 = vadd.f32 %v448_v32, %v341_v28  ;;  %v420_v35 = vpop.f32.mrf.mxu0  ;;  %v430_v36 = vpop.f32.mrf.mxu1 }
  0xd9   :  { %v459_v37 = vadd.f32 %v420_v35, %v330_v29  ;;  %v463_v38 = vadd.f32 %v430_v36, %v334_v30 }
  0xda   :  { %482 = vst [vmem:[#allocation2 + $0x40] sm:$0xff] %v466_v33 }
  0xdb   :  { %486 = vst [vmem:[#allocation2 + $0x60] sm:$0xff] %v470_v34 }
  0xdc   :  { %475 = vst [vmem:[#allocation2] sm:$0xff] %v459_v37 }
  0xdd   :  { %479 = vst [vmem:[#allocation2 + $0x68] sm:$0xff] %v463_v38 }
  0xdf   :  { %v440_v43 = vpop.f32.mrf.mxu2  ;;  %v450_v44 = vpop.f32.mrf.mxu3 }
  0xe0   :  { %v467_v45 = vadd.f32 %v440_v43, %v338_v39  ;;  %v471_v46 = vadd.f32 %v450_v44, %v342_v40  ;;  %v423_v47 = vpop.f32.mrf.mxu0  ;;  %v433_v48 = vpop.f32.mrf.mxu1 }
  0xe1   :  { %v460_v49 = vadd.f32 %v423_v47, %v331_v41  ;;  %v464_v50 = vadd.f32 %v433_v48, %v335_v42 }
  0xe2   :  { %483 = vst [vmem:[#allocation2 + $0x20] sm:$0xff] %v467_v45 }
  0xe3   :  { %487 = vst [vmem:[#allocation2 + $0x70] sm:$0xff] %v471_v46 }
  0xe4   :  { %476 = vst [vmem:[#allocation2 + $0x58] sm:$0xff] %v460_v49 }
  0xe5   :  { %480 = vst [vmem:[#allocation2 + $0x8] sm:$0xff] %v464_v50 }
  0xe7   :  { %v443_v55 = vpop.f32.mrf.mxu2  ;;  %v453_v56 = vpop.f32.mrf.mxu3 }
  0xe8   :  { %v468_v57 = vadd.f32 %v443_v55, %v339_v51  ;;  %v472_v58 = vadd.f32 %v453_v56, %v343_v52  ;;  %v425_v59 = vpop.f32.mrf.mxu0  ;;  %v435_v60 = vpop.f32.mrf.mxu1 }
  0xe9   :  { %v461_v61 = vadd.f32 %v425_v59, %v332_v53  ;;  %v465_v62 = vadd.f32 %v435_v60, %v336_v54 }
  0xea   :  { %484 = vst [vmem:[#allocation2 + $0x10] sm:$0xff] %v468_v57 }
  0xeb   :  { %488 = vst [vmem:[#allocation2 + $0x78] sm:$0xff] %v472_v58 }
  0xec   :  { %477 = vst [vmem:[#allocation2 + $0x18] sm:$0xff] %v461_v61 }
  0xed   :  { %481 = vst [vmem:[#allocation2 + $0x48] sm:$0xff] %v465_v62 }
  0xef   :  { %v445_v1 = vpop.f32.mrf.mxu2  ;;  %v455_v2 = vpop.f32.mrf.mxu3 }
  0xf0   :  { %v469_v3 = vadd.f32 %v445_v1, %v340_v63  ;;  %v473_v4 = vadd.f32 %v455_v2, %v344_v0 }
  0xf2   :  { %485 = vst [vmem:[#allocation2 + $0x38] sm:$0xff] %v469_v3 }
  0xf3   :  { %489 = vst [vmem:[#allocation2 + $0x28] sm:$0xff] %v473_v4 }
  0xf4 PF:  { %v511_v5 = vld [vmem:[%s1450_s5 + $0x10] sm:$0xff]  ;;  %v509_v6 = vld [vmem:[%s1450_s5] sm:$0xff]  ;;  %v1121_v7 = vmov 0   ;;  %v512_v9 = vld [vmem:[%s1450_s5 + $0x18] sm:$0xff]  ;;  %s867_s21 = sshll.u32 %s1451_s6, 4  ;;  %s1123_s22 = smov 128   ;;  %s868_s21 = int_to_ptr.hbm [resolvable:$true] %s867_s21 }
  0xf5   :  { %1028 = vset.pattern.permute.xlu1 %v1121_v7  ;;  %1027 = vset.pattern.permute.xlu0 %v1121_v7  ;;  %v513_v8 = vld [vmem:[%s1450_s5 + $0x20] sm:$0xff]  ;;  %v510_v10 = vld [vmem:[%s1450_s5 + $0x8] sm:$0xff]  ;;  %v516_v12 = vld [vmem:[%s1450_s5 + $0x38] sm:$0xff]  ;;  %s1124_s23 = smov 8  }
  0xf6   :  { %537 = vperm.xlu1 %1028, %v511_v5   ;;  %527 = vperm.xlu0 %1027, %v509_v6   ;;  %v514_v11 = vld [vmem:[%s1450_s5 + $0x28] sm:$0xff]  ;;  %v515_v13 = vld [vmem:[%s1450_s5 + $0x30] sm:$0xff]  ;;  %v517_v14 = vld [vmem:[%s1450_s5 + $0x40] sm:$0xff] }
  0xf7   :  { %1029 = vset.pattern.permute.xlu2 %v1121_v7  ;;  %v519_v15 = vld [vmem:[%s1450_s5 + $0x50] sm:$0xff]  ;;  %v518_v16 = vld [vmem:[%s1450_s5 + $0x48] sm:$0xff]  ;;  %v520_v17 = vld [vmem:[%s1450_s5 + $0x58] sm:$0xff] }
  0xf8   :  { %547 = vperm.xlu2 %1029, %v513_v8   ;;  %v522_v18 = vld [vmem:[%s1450_s5 + $0x68] sm:$0xff]  ;;  %v521_v19 = vld [vmem:[%s1450_s5 + $0x60] sm:$0xff]  ;;  %v523_v20 = vld [vmem:[%s1450_s5 + $0x70] sm:$0xff] }
  0xf9   :  { %v524_v21 = vld [vmem:[%s1450_s5 + $0x78] sm:$0xff]  ;;  %v991_v22 = vld [vmem:[#allocation7 + $0x8] sm:$0xff]   ;;  %v960_v23 = vld [vmem:[#allocation7] sm:$0xff]   ;;  %s1122_s5 = smov [#allocation8]  }
  0xfa   :  { %v495_v24 = vld [vmem:[#allocation2 + $0x58] sm:$0xff]  ;;  %v493_v25 = vld [vmem:[#allocation2 + $0x30] sm:$0xff]  ;;  %v965_v26 = vunpack.c.l.bf16 %v991_v22  ;;  %v961_v27 = vunpack.c.l.bf16 %v960_v23  ;;  %v494_v39 = vld [vmem:[#allocation2] sm:$0xff]  ;;  %v962_v40 = vunpack.c.h.bf16 %v960_v23  ;;  %v966_v51 = vunpack.c.h.bf16 %v991_v22  ;;  %s865_s18 = sshll.u32 %s1122_s5, 4  ;;  %s866_s18 = int_to_ptr.vmem [resolvable:$true] %s865_s18 }
  0xfb   :  { %v992_v32 = vld [vmem:[#allocation7 + $0x10] sm:$0xff]   ;;  %v496_v46 = vld [vmem:[#allocation2 + $0x18] sm:$0xff]  ;;  %v500_v49 = vld [vmem:[#allocation2 + $0x48] sm:$0xff] }
  0xfc   :  { %v497_v33 = vld [vmem:[#allocation2 + $0x50] sm:$0xff]  ;;  %v969_v37 = vunpack.c.l.bf16 %v992_v32  ;;  %v993_v47 = vld [vmem:[#allocation7 + $0x18] sm:$0xff]   ;;  %v499_v50 = vld [vmem:[#allocation2 + $0x8] sm:$0xff]  ;;  %v970_v3 = vunpack.c.h.bf16 %v992_v32 }
  0xfd   :  { %v974_v53 = vunpack.c.h.bf16 %v993_v47  ;;  %v973_v54 = vunpack.c.l.bf16 %v993_v47  ;;  %v498_v62 = vld [vmem:[#allocation2 + $0x68] sm:$0xff]  ;;  %v994_v63 = vld [vmem:[#allocation7 + $0x20] sm:$0xff]   ;;  %v503_v1 = vld [vmem:[#allocation2 + $0x10] sm:$0xff] }
  0xfe   :  { %542 = vperm.xlu1 %1028, %v512_v9   ;;  %532 = vperm.xlu0 %1027, %v510_v10   ;;  %v995_v0 = vld [vmem:[#allocation7 + $0x28] sm:$0xff]   ;;  %v502_v2 = vld [vmem:[#allocation2 + $0x20] sm:$0xff]  ;;  %v978_v7 = vunpack.c.h.bf16 %v994_v63  ;;  %v997_v32 = vld [vmem:[#allocation7 + $0x38] sm:$0xff]  }
  0xff   :  { %v981_v6 = vunpack.c.l.bf16 %v995_v0  ;;  %v989_v47 = vunpack.c.l.bf16 %v997_v32 }
 0x100   :  { %552 = vperm.xlu2 %1029, %v514_v11  }
 0x106   :  { %562 = vperm.xlu1 %1028, %v516_v12   ;;  %557 = vperm.xlu0 %1027, %v515_v13  }
 0x108   :  { %567 = vperm.xlu2 %1029, %v517_v14  }
 0x10e   :  { %577 = vperm.xlu1 %1028, %v519_v15   ;;  %572 = vperm.xlu0 %1027, %v518_v16   ;;  %v501_v15 = vld [vmem:[#allocation2 + $0x40] sm:$0xff]  ;;  %v996_v16 = vld [vmem:[#allocation7 + $0x30] sm:$0xff]  }
 0x10f   :  { %v985_v22 = vunpack.c.l.bf16 %v996_v16 }
 0x110   :  { %582 = vperm.xlu2 %1029, %v520_v17   ;;  %v506_v17 = vld [vmem:[#allocation2 + $0x70] sm:$0xff] }
 0x116   :  { %592 = vperm.xlu1 %1028, %v522_v18   ;;  %587 = vperm.xlu0 %1027, %v521_v19   ;;  %v505_v18 = vld [vmem:[#allocation2 + $0x60] sm:$0xff]  ;;  %v977_v19 = vunpack.c.l.bf16 %v994_v63 }
 0x118   :  { %597 = vperm.xlu2 %1029, %v523_v20  }
 0x11e   :  { %602 = vperm.xlu0 %1027, %v524_v21   ;;  %v986_v21 = vunpack.c.h.bf16 %v996_v16 }
 0x152   :  { %v548_v34 = vpop.permute.xlu2 %547 }
 0x153   :  { %v609_v38 = vmul.f32 %v548_v34, %v497_v33  ;;  %v508_v33 = vld [vmem:[#allocation2 + $0x28] sm:$0xff]  ;;  %v982_v34 = vunpack.c.h.bf16 %v995_v0 }
 0x155   :  { %v1304_v43 = vadd.f32 %v969_v37, %v609_v38  ;;  %v990_v38 = vunpack.c.h.bf16 %v997_v32 }
 0x15a   :  { %v553_v48 = vpop.permute.xlu2 %552 }
 0x15b   :  { %v610_v4 = vmul.f32 %v553_v48, %v498_v62 }
 0x15d   :  { %v1319_v12 = vadd.f32 %v970_v3, %v610_v4 }
 0x162   :  { %v568_v5 = vpop.permute.xlu2 %567 }
 0x163   :  { %v613_v20 = vmul.f32 %v568_v5, %v501_v15 }
 0x168   :  { %v538_v28 = vpop.permute.xlu1 %537  ;;  %v528_v29 = vpop.permute.xlu0 %527 }
 0x169   :  { %v607_v30 = vmul.f32 %v538_v28, %v495_v24  ;;  %v605_v31 = vmul.f32 %v528_v29, %v493_v25  ;;  %v1328_v28 = vadd.f32 %v977_v19, %v613_v20 }
 0x16b   :  { %v1298_v35 = vadd.f32 %v965_v26, %v607_v30  ;;  %v1300_v36 = vadd.f32 %v961_v27, %v605_v31  ;;  %v583_v27 = vpop.permute.xlu2 %582  ;;  %v504_v31 = vld [vmem:[#allocation2 + $0x38] sm:$0xff] }
 0x16c   :  { %v616_v37 = vmul.f32 %v583_v27, %v504_v31 }
 0x16d   :  { %673 = vmax.xlane.f32.xlu0 %v1298_v35  ;;  %669 = vmax.xlane.f32.xlu1 %v1300_v36 }
 0x170   :  { %v543_v41 = vpop.permute.xlu1 %542  ;;  %v533_v42 = vpop.permute.xlu0 %532 }
 0x171   :  { %v606_v44 = vmul.f32 %v533_v42, %v494_v39  ;;  %v608_v52 = vmul.f32 %v543_v41, %v496_v46  ;;  %v1337_v41 = vadd.f32 %v982_v34, %v616_v37  ;;  %v507_v46 = vld [vmem:[#allocation2 + $0x78] sm:$0xff] }
 0x173   :  { %v1306_v45 = vadd.f32 %v962_v40, %v606_v44  ;;  %v1310_v59 = vadd.f32 %v966_v51, %v608_v52  ;;  %v598_v44 = vpop.permute.xlu2 %597 }
 0x174   :  { %v619_v48 = vmul.f32 %v598_v44, %v507_v46 }
 0x175   :  { %671 = vmax.xlane.f32.xlu2 %v1306_v45  ;;  %677 = vmax.xlane.f32.xlu1 %v1304_v43 }
 0x178   :  { %v563_v55 = vpop.permute.xlu1 %562  ;;  %v558_v56 = vpop.permute.xlu0 %557 }
 0x179   :  { %v612_v57 = vmul.f32 %v563_v55, %v500_v49  ;;  %v611_v58 = vmul.f32 %v558_v56, %v499_v50  ;;  %v1343_v49 = vadd.f32 %v989_v47, %v619_v48 }
 0x17b   :  { %v1312_v60 = vadd.f32 %v974_v53, %v612_v57  ;;  %v1314_v61 = vadd.f32 %v973_v54, %v611_v58 }
 0x17d   :  { %681 = vmax.xlane.f32.xlu0 %v1314_v61  ;;  %675 = vmax.xlane.f32.xlu2 %v1310_v59 }
 0x17e   :  { %683 = vmax.xlane.f32.xlu1 %v1312_v60 }
 0x180   :  { %v578_v8 = vpop.permute.xlu1 %577  ;;  %v573_v9 = vpop.permute.xlu0 %572 }
 0x181   :  { %v615_v10 = vmul.f32 %v578_v8, %v503_v1  ;;  %v614_v11 = vmul.f32 %v573_v9, %v502_v2 }
 0x183   :  { %v1321_v13 = vadd.f32 %v981_v6, %v615_v10  ;;  %v1323_v14 = vadd.f32 %v978_v7, %v614_v11 }
 0x185   :  { %687 = vmax.xlane.f32.xlu0 %v1323_v14  ;;  %679 = vmax.xlane.f32.xlu2 %v1319_v12 }
 0x186   :  { %689 = vmax.xlane.f32.xlu1 %v1321_v13 }
 0x188   :  { %v593_v23 = vpop.permute.xlu1 %592  ;;  %v588_v24 = vpop.permute.xlu0 %587 }
 0x189   :  { %v618_v25 = vmul.f32 %v593_v23, %v506_v17  ;;  %v617_v26 = vmul.f32 %v588_v24, %v505_v18 }
 0x18b   :  { %v1330_v29 = vadd.f32 %v986_v21, %v618_v25  ;;  %v1332_v30 = vadd.f32 %v985_v22, %v617_v26 }
 0x18d   :  { %693 = vmax.xlane.f32.xlu0 %v1332_v30  ;;  %685 = vmax.xlane.f32.xlu2 %v1328_v28 }
 0x18e   :  { %695 = vmax.xlane.f32.xlu1 %v1330_v29 }
 0x190   :  { %v603_v39 = vpop.permute.xlu0 %602 }
 0x191   :  { %v620_v40 = vmul.f32 %v603_v39, %v508_v33 }
 0x193   :  { %v1339_v42 = vadd.f32 %v990_v38, %v620_v40 }
 0x195   :  { %699 = vmax.xlane.f32.xlu0 %v1339_v42  ;;  %691 = vmax.xlane.f32.xlu2 %v1337_v41 }
 0x19d   :  { %697 = vmax.xlane.f32.xlu2 %v1343_v49 }
 0x1e0   :  { %v1346_v50 = vpop.xlane.xlu0 %673  ;;  %v1348_v51 = vpop.xlane.xlu1 %669 }
 0x1e1   :  { %v703_v52 = vsub.f32 %v1298_v35, %v1346_v50  ;;  %v701_v53 = vsub.f32 %v1300_v36, %v1348_v51 }
 0x1e3   :  { %v721_v54 = vmul.f32 1.442695, %v703_v52  ;;  %v717_v55 = vmul.f32 1.442695, %v701_v53 }
 0x1e5   :  { %1030 = vpow2.f32 %v721_v54 }
 0x1e6   :  { %1032 = vpow2.f32 %v717_v55 }
 0x1e8   :  { %v1354_v56 = vpop.xlane.xlu2 %671  ;;  %v1356_v57 = vpop.xlane.xlu1 %677 }
 0x1e9   :  { %v702_v58 = vsub.f32 %v1306_v45, %v1354_v56  ;;  %v705_v1 = vsub.f32 %v1304_v43, %v1356_v57 }
 0x1eb   :  { %v1031_v62 = vpop.eup %1030  ;;  %v719_v63 = vmul.f32 1.442695, %v702_v58  ;;  %v725_v4 = vmul.f32 1.442695, %v705_v1 }
 0x1ec   :  { %v1033_v0 = vpop.eup %1032  ;;  %753 = vadd.xlane.f32.xlu0 %v1031_v62 }
 0x1ed   :  { %1034 = vpow2.f32 %v719_v63  ;;  %749 = vadd.xlane.f32.xlu1 %v1033_v0 }
 0x1ee   :  { %1036 = vpow2.f32 %v725_v4 }
 0x1f0   :  { %v1362_v2 = vpop.xlane.xlu0 %681  ;;  %v1364_v3 = vpop.xlane.xlu2 %675 }
 0x1f1   :  { %v704_v5 = vsub.f32 %v1310_v59, %v1364_v3  ;;  %v1368_v6 = vpop.xlane.xlu1 %683  ;;  %v707_v9 = vsub.f32 %v1314_v61, %v1362_v2 }
 0x1f2   :  { %v708_v10 = vsub.f32 %v1312_v60, %v1368_v6 }
 0x1f3   :  { %v1035_v7 = vpop.eup %1034  ;;  %v723_v8 = vmul.f32 1.442695, %v704_v5  ;;  %v729_v11 = vmul.f32 1.442695, %v707_v9 }
 0x1f4   :  { %751 = vadd.xlane.f32.xlu2 %v1035_v7  ;;  %v731_v17 = vmul.f32 1.442695, %v708_v10  ;;  %v1037_v20 = vpop.eup %1036 }
 0x1f5   :  { %1038 = vpow2.f32 %v723_v8 }
 0x1f6   :  { %1040 = vpow2.f32 %v729_v11 }
 0x1f7   :  { %1042 = vpow2.f32 %v731_v17 }
 0x1f8   :  { %v1374_v15 = vpop.xlane.xlu0 %687  ;;  %v1376_v16 = vpop.xlane.xlu2 %679 }
 0x1f9   :  { %v706_v18 = vsub.f32 %v1319_v12, %v1376_v16  ;;  %v1380_v19 = vpop.xlane.xlu1 %689  ;;  %v710_v23 = vsub.f32 %v1323_v14, %v1374_v15 }
 0x1fa   :  { %v711_v24 = vsub.f32 %v1321_v13, %v1380_v19 }
 0x1fb   :  { %v727_v21 = vmul.f32 1.442695, %v706_v18  ;;  %v1039_v22 = vpop.eup %1038  ;;  %v735_v25 = vmul.f32 1.442695, %v710_v23 }
 0x1fc   :  { %757 = vadd.xlane.f32.xlu2 %v1037_v20  ;;  %755 = vadd.xlane.f32.xlu1 %v1039_v22  ;;  %v737_v27 = vmul.f32 1.442695, %v711_v24  ;;  %v1041_v33 = vpop.eup %1040 }
 0x1fd   :  { %1044 = vpow2.f32 %v727_v21  ;;  %v1043_v37 = vpop.eup %1042 }
 0x1fe   :  { %1046 = vpow2.f32 %v735_v25 }
 0x1ff   :  { %1048 = vpow2.f32 %v737_v27 }
 0x200   :  { %v1386_v26 = vpop.xlane.xlu2 %685  ;;  %v1388_v31 = vpop.xlane.xlu0 %693 }
 0x201   :  { %v709_v32 = vsub.f32 %v1328_v28, %v1386_v26  ;;  %v1392_v34 = vpop.xlane.xlu1 %695  ;;  %v713_v40 = vsub.f32 %v1332_v30, %v1388_v31 }
 0x202   :  { %v714_v44 = vsub.f32 %v1330_v29, %v1392_v34 }
 0x203   :  { %v733_v38 = vmul.f32 1.442695, %v709_v32  ;;  %v1045_v39 = vpop.eup %1044  ;;  %v741_v46 = vmul.f32 1.442695, %v713_v40 }
 0x204   :  { %763 = vadd.xlane.f32.xlu2 %v1043_v37  ;;  %759 = vadd.xlane.f32.xlu0 %v1045_v39  ;;  %v743_v48 = vmul.f32 1.442695, %v714_v44  ;;  %v1047_v53 = vpop.eup %1046 }
 0x205   :  { %761 = vadd.xlane.f32.xlu1 %v1041_v33  ;;  %1050 = vpow2.f32 %v733_v38  ;;  %v1049_v54 = vpop.eup %1048 }
 0x206   :  { %1052 = vpow2.f32 %v741_v46 }
 0x207   :  { %1054 = vpow2.f32 %v743_v48 }
 0x208   :  { %v1398_v47 = vpop.xlane.xlu2 %691  ;;  %v1402_v55 = vpop.xlane.xlu0 %699 }
 0x209   :  { %v712_v52 = vsub.f32 %v1337_v41, %v1398_v47  ;;  %v716_v63 = vsub.f32 %v1339_v42, %v1402_v55 }
 0x20b   :  { %v739_v58 = vmul.f32 1.442695, %v712_v52  ;;  %v1051_v62 = vpop.eup %1050  ;;  %v747_v5 = vmul.f32 1.442695, %v716_v63 }
 0x20c   :  { %769 = vadd.xlane.f32.xlu2 %v1049_v54  ;;  %765 = vadd.xlane.f32.xlu0 %v1051_v62  ;;  %v1053_v4 = vpop.eup %1052 }
 0x20d   :  { %767 = vadd.xlane.f32.xlu1 %v1047_v53  ;;  %1056 = vpow2.f32 %v739_v58  ;;  %v1055_v7 = vpop.eup %1054 }
 0x210   :  { %v1406_v0 = vpop.xlane.xlu2 %697 }
 0x211   :  { %v715_v1 = vsub.f32 %v1343_v49, %v1406_v0 }
 0x213   :  { %v745_v8 = vmul.f32 1.442695, %v715_v1  ;;  %v1057_v9 = vpop.eup %1056 }
 0x214   :  { %775 = vadd.xlane.f32.xlu2 %v1055_v7  ;;  %771 = vadd.xlane.f32.xlu0 %v1057_v9 }
 0x215   :  { %1058 = vpow2.f32 %v745_v8  ;;  %773 = vadd.xlane.f32.xlu1 %v1053_v4 }
 0x216   :  { %1060 = vpow2.f32 %v747_v5 }
 0x21b   :  { %v1059_v10 = vpop.eup %1058 }
 0x21c   :  { %v1061_v11 = vpop.eup %1060  ;;  %777 = vadd.xlane.f32.xlu0 %v1059_v10 }
 0x21d   :  { %779 = vadd.xlane.f32.xlu1 %v1061_v11 }
 0x25f   :  { %v754_v17 = vpop.xlane.xlu0 %753 }
 0x260   :  { %1062 = vlog2.f32 %v754_v17  ;;  %v750_v18 = vpop.xlane.xlu1 %749 }
 0x261   :  { %1064 = vlog2.f32 %v750_v18 }
 0x266   :  { %v1063_v20 = vpop.eup %1062 }
 0x267   :  { %v1065_v21 = vpop.eup %1064  ;;  %v786_v22 = vmul.f32 0.6931472, %v1063_v20  ;;  %v752_v23 = vpop.xlane.xlu2 %751 }
 0x268   :  { %v782_v24 = vmul.f32 0.6931472, %v1065_v21  ;;  %1066 = vlog2.f32 %v752_v23 }
 0x269   :  { %v815_v25 = vadd.f32 %v786_v22, %v1346_v50 }
 0x26a   :  { %v813_v27 = vadd.f32 %v782_v24, %v1348_v51 }
 0x26b   :  { %v831_v32 = vsub.f32 %v1298_v35, %v815_v25 }
 0x26c   :  { %v829_v33 = vsub.f32 %v1300_v36, %v813_v27 }
 0x26d   :  { %847 = vst [vmem:[#allocation8 + $0x10] sm:$0xff] %v831_v32 }
 0x26e   :  { %v1067_v37 = vpop.eup %1066  ;;  %845 = vst [vmem:[#allocation8] sm:$0xff] %v829_v33 }
 0x26f   :  { %v784_v38 = vmul.f32 0.6931472, %v1067_v37  ;;  %v758_v39 = vpop.xlane.xlu2 %757  ;;  %v756_v40 = vpop.xlane.xlu1 %755 }
 0x270   :  { %1068 = vlog2.f32 %v758_v39 }
 0x271   :  { %v814_v44 = vadd.f32 %v784_v38, %v1354_v56  ;;  %1070 = vlog2.f32 %v756_v40 }
 0x273   :  { %v830_v46 = vsub.f32 %v1306_v45, %v814_v44 }
 0x275   :  { %846 = vst [vmem:[#allocation8 + $0x8] sm:$0xff] %v830_v46 }
 0x276   :  { %v1069_v50 = vpop.eup %1068 }
 0x277   :  { %v1071_v48 = vpop.eup %1070  ;;  %v790_v51 = vmul.f32 0.6931472, %v1069_v50  ;;  %v764_v52 = vpop.xlane.xlu2 %763 }
 0x278   :  { %v788_v35 = vmul.f32 0.6931472, %v1071_v48  ;;  %v760_v53 = vpop.xlane.xlu0 %759  ;;  %1072 = vlog2.f32 %v764_v52  ;;  %v762_v36 = vpop.xlane.xlu1 %761 }
 0x279   :  { %v817_v54 = vadd.f32 %v790_v51, %v1356_v57  ;;  %1074 = vlog2.f32 %v760_v53 }
 0x27a   :  { %v816_v58 = vadd.f32 %v788_v35, %v1364_v3  ;;  %1076 = vlog2.f32 %v762_v36 }
 0x27b   :  { %v833_v56 = vsub.f32 %v1304_v43, %v817_v54 }
 0x27c   :  { %v832_v62 = vsub.f32 %v1310_v59, %v816_v58 }
 0x27d   :  { %849 = vst [vmem:[#allocation8 + $0x20] sm:$0xff] %v833_v56 }
 0x27e   :  { %v1073_v45 = vpop.eup %1072  ;;  %848 = vst [vmem:[#allocation8 + $0x18] sm:$0xff] %v832_v62 }
 0x27f   :  { %v1075_v63 = vpop.eup %1074  ;;  %v796_v1 = vmul.f32 0.6931472, %v1073_v45  ;;  %v770_v4 = vpop.xlane.xlu2 %769 }
 0x280   :  { %v1077_v5 = vpop.eup %1076  ;;  %v792_v7 = vmul.f32 0.6931472, %v1075_v63  ;;  %v766_v8 = vpop.xlane.xlu0 %765  ;;  %1078 = vlog2.f32 %v770_v4 }
 0x281   :  { %v768_v9 = vpop.xlane.xlu1 %767  ;;  %v820_v57 = vadd.f32 %v796_v1, %v1368_v6  ;;  %v794_v10 = vmul.f32 0.6931472, %v1077_v5  ;;  %1080 = vlog2.f32 %v766_v8 }
 0x282   :  { %v818_v3 = vadd.f32 %v792_v7, %v1376_v16  ;;  %1082 = vlog2.f32 %v768_v9 }
 0x283   :  { %v836_v43 = vsub.f32 %v1312_v60, %v820_v57  ;;  %v819_v59 = vadd.f32 %v794_v10, %v1362_v2 }
 0x284   :  { %v834_v11 = vsub.f32 %v1319_v12, %v818_v3 }
 0x285   :  { %852 = vst [vmem:[#allocation8 + $0x38] sm:$0xff] %v836_v43  ;;  %v835_v17 = vsub.f32 %v1314_v61, %v819_v59 }
 0x286   :  { %v1079_v18 = vpop.eup %1078  ;;  %850 = vst [vmem:[#allocation8 + $0x28] sm:$0xff] %v834_v11 }
 0x287   :  { %v1081_v20 = vpop.eup %1080  ;;  %851 = vst [vmem:[#allocation8 + $0x30] sm:$0xff] %v835_v17  ;;  %v802_v21 = vmul.f32 0.6931472, %v1079_v18  ;;  %v776_v6 = vpop.xlane.xlu2 %775 }
 0x288   :  { %v1083_v22 = vpop.eup %1082  ;;  %v798_v23 = vmul.f32 0.6931472, %v1081_v20  ;;  %v772_v24 = vpop.xlane.xlu0 %771  ;;  %1084 = vlog2.f32 %v776_v6 }
 0x289   :  { %v774_v16 = vpop.xlane.xlu1 %773  ;;  %v823_v60 = vadd.f32 %v802_v21, %v1380_v19  ;;  %v800_v25 = vmul.f32 0.6931472, %v1083_v22  ;;  %1086 = vlog2.f32 %v772_v24 }
 0x28a   :  { %v821_v12 = vadd.f32 %v798_v23, %v1386_v26  ;;  %1088 = vlog2.f32 %v774_v16 }
 0x28b   :  { %v839_v61 = vsub.f32 %v1321_v13, %v823_v60  ;;  %v822_v2 = vadd.f32 %v800_v25, %v1374_v15 }
 0x28c   :  { %v837_v27 = vsub.f32 %v1328_v28, %v821_v12 }
 0x28d   :  { %855 = vst [vmem:[#allocation8 + $0x50] sm:$0xff] %v839_v61  ;;  %v838_v32 = vsub.f32 %v1323_v14, %v822_v2 }
 0x28e   :  { %v1085_v33 = vpop.eup %1084  ;;  %853 = vst [vmem:[#allocation8 + $0x40] sm:$0xff] %v837_v27 }
 0x28f   :  { %v1087_v37 = vpop.eup %1086  ;;  %854 = vst [vmem:[#allocation8 + $0x48] sm:$0xff] %v838_v32  ;;  %v808_v38 = vmul.f32 0.6931472, %v1085_v33 }
 0x290   :  { %v1089_v19 = vpop.eup %1088  ;;  %v804_v39 = vmul.f32 0.6931472, %v1087_v37  ;;  %v778_v40 = vpop.xlane.xlu0 %777 }
 0x291   :  { %v780_v44 = vpop.xlane.xlu1 %779  ;;  %v826_v26 = vadd.f32 %v808_v38, %v1392_v34  ;;  %v806_v46 = vmul.f32 0.6931472, %v1089_v19  ;;  %1090 = vlog2.f32 %v778_v40 }
 0x292   :  { %v824_v13 = vadd.f32 %v804_v39, %v1398_v47  ;;  %1092 = vlog2.f32 %v780_v44 }
 0x293   :  { %v842_v28 = vsub.f32 %v1330_v29, %v826_v26  ;;  %v825_v14 = vadd.f32 %v806_v46, %v1388_v31 }
 0x294   :  { %v840_v15 = vsub.f32 %v1337_v41, %v824_v13 }
 0x295   :  { %858 = vst [vmem:[#allocation8 + $0x68] sm:$0xff] %v842_v28  ;;  %v841_v50 = vsub.f32 %v1332_v30, %v825_v14 }
 0x296   :  { %856 = vst [vmem:[#allocation8 + $0x58] sm:$0xff] %v840_v15 }
 0x297   :  { %v1091_v48 = vpop.eup %1090  ;;  %857 = vst [vmem:[#allocation8 + $0x60] sm:$0xff] %v841_v50 }
 0x298   :  { %v1093_v51 = vpop.eup %1092  ;;  %v810_v52 = vmul.f32 0.6931472, %v1091_v48 }
 0x299   :  { %v812_v34 = vmul.f32 0.6931472, %v1093_v51 }
 0x29a   :  { %v827_v29 = vadd.f32 %v810_v52, %v1406_v0 }
 0x29b   :  { %v828_v31 = vadd.f32 %v812_v34, %v1402_v55 }
 0x29c   :  { %v843_v41 = vsub.f32 %v1343_v49, %v827_v29 }
 0x29d   :  { %v844_v30 = vsub.f32 %v1339_v42, %v828_v31 }
 0x29e   :  { %859 = vst [vmem:[#allocation8 + $0x70] sm:$0xff] %v843_v41 }
 0x29f   :  { %860 = vst [vmem:[#allocation8 + $0x78] sm:$0xff] %v844_v30 }
 0x2a0   :  { %873 = dma.vmem_to_hbm [thread:$0]  %s866_s18, 2048, %s868_s21, [#allocation9], %s1123_s22, %s1123_s22, %s1124_s23  }
 0x2a1   :  { %1118 = dma.done.wait [#allocation9], 2048  }
 0x2a2   :  { %1119 = vsyncadd [#allocation9], 4294965248 }
 0x2a3   :  { %878 = vsyncpa [#allocation9], 1 }

</bundles_post_ra>
